<compile_context>
chip_gen: v7x
topology: tpu7x:2x2x1
jax: 0.10.0
libtpu: 0.0.40
codegen_flags: <defaults>
</compile_context>

<pallas_src>
import jax
import jax.numpy as jnp
from jax import lax
from jax.experimental import pallas as pl
from jax.experimental.pallas import tpu as pltpu


def _round_up(v, m):
    return (v + m - 1) // m * m


def _tpu_vmem_capacity_bytes():
    """Physical per-core VMEM; conservative (v7x-sized) fallback if unknown."""
    try:
        cap = getattr(pltpu.get_tpu_info(), "vmem_capacity_bytes", None)
        if cap:
            return int(cap)
    except Exception:
        pass
    return 64 * 1024 * 1024


# -----------------------------------------------------------------------------
# Kernel 1: v2e.  grid = (B, E_tiles, N_tiles); the N-tile axis is a reduction.
# Accumulates A = H^T @ X and deg_e in VMEM scratch; projects/normalizes once in
# the finalize and writes the normalized hyperedge features in the compute dtype.
# -----------------------------------------------------------------------------
def _v2e_kernel(x_ref, h_ref, w_ref, b_ref, e_ref, acc_ref, deg_ref):
    # x_ref: [tn, C1]   h_ref: [tn, te]   w_ref: [C1, C2p]   b_ref: [1, C2p] f32
    # e_ref: [te, C2p] (output, compute dtype)
    # acc_ref: [te, C1] f32   deg_ref: [te, 1] f32   (scratch accumulators)
    ni = pl.program_id(2)

    @pl.when(ni == 0)
    def _init():
        acc_ref[...] = jnp.zeros_like(acc_ref)
        deg_ref[...] = jnp.zeros_like(deg_ref)

    h = h_ref[...]

    # A += H^T @ X : contract the node axis of both operands (transposed-LHS MXU
    # feed, no XLU transpose pass, f32 accumulation).
    acc_ref[...] += lax.dot_general(
        h, x_ref[...],
        dimension_numbers=(((0,), (0,)), ((), ())),
        preferred_element_type=jnp.float32)                          # [te, C1]

    # deg_e += H^T @ 1 : exact integer counts accumulated in f32, produced
    # directly in the [te, 1] column orientation the finalize needs.
    deg_ref[...] += lax.dot_general(
        h, jnp.ones((h.shape[0], 1), dtype=h.dtype),
        dimension_numbers=(((0,), (0,)), ((), ())),
        preferred_element_type=jnp.float32)                          # [te, 1]

    @pl.when(ni == pl.num_programs(2) - 1)
    def _finalize():
        d = deg_ref[...]                                             # [te, 1]
        nonempty = d > 0.0
        # EUP approximate reciprocal, masked so empty hyperedges -> 0 (isinf -> 0).
        inv = jnp.where(nonempty, pl.reciprocal(d, approx=True), 0.0)
        a = (acc_ref[...] * inv).astype(w_ref.dtype)                 # [te, C1]
        # One projection per (batch, E-tile):  E = (A / deg_e) @ W + b.
        e = jnp.dot(a, w_ref[...],
                    preferred_element_type=jnp.float32) + b_ref[...] # [te, C2p]
        # Empty hyperedges must be exactly 0 (the bias would otherwise leak in).
        e_ref[...] = jnp.where(nonempty, e, 0.0).astype(e_ref.dtype)


# -----------------------------------------------------------------------------
# Kernel 2: e2v.  grid = (B, N_tiles); fully parallel.
# -----------------------------------------------------------------------------
def _e2v_kernel(h_ref, e_ref, o_ref):
    # h_ref: [tn, Ep]   e_ref: [Ep, C2p] (normalized, compute dtype)
    # o_ref: [tn, C2p]
    h = h_ref[...]

    # Node degree: exact integer counts, f32 accumulation (no materialized f32
    # copy of the H tile).
    deg_v = jnp.sum(h, axis=1, dtype=jnp.float32, keepdims=True)     # [tn, 1]
    inv_v = jnp.where(deg_v > 0.0, pl.reciprocal(deg_v, approx=True), 0.0)

    v = jnp.dot(h, e_ref[...], preferred_element_type=jnp.float32)   # [tn, C2p]
    o_ref[...] = (inv_v * v).astype(o_ref.dtype)


def hypconv(x, H, w, b, *, tile_n=None, tile_e=None):
    """x: [B, N, C1], H: [B, N, E], w: [C1, C2], b: [C2] -> [B, N, C2].

    Matches HyPConv.forward: fc -> v2e (mean over nodes) -> e2v (mean over
    hyperedges).  Pass bf16 x/H/w for the fast MXU path (H is 0/1 so exact);
    all matmul accumulation is f32 and degree counts are accumulated in f32.
    """
    B, N, C1 = x.shape
    _, _, E = H.shape
    C2 = w.shape[1]
    cdt = x.dtype
    itemsize = jnp.dtype(cdt).itemsize

    # --- generation-aware sizing (v5e/v6e: 128 MiB VMEM -> bigger tiles;
    #     v7x: 64 MiB -> smaller tiles and a tighter scoped limit). ---
    vmem_cap = _tpu_vmem_capacity_bytes()
    small_vmem = vmem_cap <= 64 * 1024 * 1024
    if tile_n is None:
        tile_n = 256 if small_vmem else 512
    vmem_limit = (56 if small_vmem else 96) * 1024 * 1024

    # --- padding: lane-dense E / C2 (multiples of 128); N tiled on a 16-aligned
    #     tile (covers bf16 sublane packing; also valid for f32). ---
    sub = 16
    tn = max(sub, min(int(tile_n), _round_up(N, sub)))
    tn = _round_up(tn, sub)
    Np = _round_up(N, tn)
    num_nt = Np // tn

    Ep = _round_up(E, 128)
    if tile_e is None:
        tile_e = Ep if Ep <= 512 else next(
            c for c in (512, 384, 256, 128) if Ep % c == 0)
    tile_e = _round_up(max(128, min(int(tile_e), Ep)), 128)
    Ep = _round_up(Ep, tile_e)
    num_et = Ep // tile_e

    C2p = _round_up(C2, 128)

    xp = jnp.pad(x.astype(cdt), ((0, 0), (0, Np - N), (0, 0)))
    Hp = jnp.pad(H.astype(cdt), ((0, 0), (0, Np - N), (0, Ep - E)))
    wp = jnp.pad(w.astype(cdt), ((0, 0), (0, C2p - C2)))
    bp = jnp.pad(b.astype(jnp.float32), (0, C2p - C2)).reshape(1, C2p)

    # ---------------- pass 1: v2e (normalized hyperedge features) -------------
    e_norm = pl.pallas_call(
        _v2e_kernel,
        out_shape=jax.ShapeDtypeStruct((B, Ep, C2p), cdt),
        grid_spec=pltpu.PrefetchScalarGridSpec(
            num_scalar_prefetch=0,
            grid=(B, num_et, num_nt),
            in_specs=[
                pl.BlockSpec((None, tn, C1), lambda bi, ei, ni: (bi, ni, 0)),
                pl.BlockSpec((None, tn, tile_e), lambda bi, ei, ni: (bi, ni, ei)),
                pl.BlockSpec((C1, C2p), lambda bi, ei, ni: (0, 0)),   # W: resident
                pl.BlockSpec((1, C2p), lambda bi, ei, ni: (0, 0)),    # b: resident
            ],
            out_specs=pl.BlockSpec((None, tile_e, C2p),
                                   lambda bi, ei, ni: (bi, ei, 0)),
            scratch_shapes=[
                pltpu.VMEM((tile_e, C1), jnp.float32),   # A = H^T @ X accumulator
                pltpu.VMEM((tile_e, 1), jnp.float32),    # deg_e accumulator
            ],
        ),
        compiler_params=pltpu.CompilerParams(
            dimension_semantics=("parallel", "parallel", "arbitrary"),
            vmem_limit_bytes=vmem_limit),
        cost_estimate=pl.CostEstimate(
            flops=2 * B * Np * Ep * (C1 + 1) + 2 * B * Ep * C1 * C2p,
            transcendentals=0,
            bytes_accessed=(B * Np * C1 * itemsize * num_et
                            + B * Np * Ep * itemsize
                            + (C1 * C2p + C2p) * itemsize
                            + B * Ep * C2p * itemsize)),
    )(xp, Hp, wp, bp)

    # ---------------- pass 2: e2v (output node features) ----------------------
    out_p = pl.pallas_call(
        _e2v_kernel,
        out_shape=jax.ShapeDtypeStruct((B, Np, C2p), cdt),
        grid_spec=pltpu.PrefetchScalarGridSpec(
            num_scalar_prefetch=0,
            grid=(B, num_nt),
            in_specs=[
                pl.BlockSpec((None, tn, Ep), lambda bi, ni: (bi, ni, 0)),
                pl.BlockSpec((None, Ep, C2p), lambda bi, ni: (bi, 0, 0)),  # per-batch resident
            ],
            out_specs=pl.BlockSpec((None, tn, C2p), lambda bi, ni: (bi, ni, 0)),
        ),
        compiler_params=pltpu.CompilerParams(
            dimension_semantics=("parallel", "parallel"),
            vmem_limit_bytes=vmem_limit),
        cost_estimate=pl.CostEstimate(
            flops=2 * B * Np * Ep * C2p,
            transcendentals=0,
            bytes_accessed=B * (Np * Ep + Ep * C2p + Np * C2p) * itemsize),
    )(Hp, e_norm)

    return out_p[:, :N, :C2]


def hypconv_ref(x, H, w, b):
    """Plain-JAX f32 reference mirroring the PyTorch forward."""
    hp = "highest"
    xf = jnp.einsum("bnc,cd->bnd", x, w, precision=hp) + b
    Ht = jnp.swapaxes(H, 1, 2)                        # [B, E, N]
    e = jnp.einsum("ben,bnd->bed", Ht, xf, precision=hp)
    de = jnp.sum(Ht, axis=2, keepdims=True)
    e = jnp.where(de == 0.0, 0.0, 1.0 / de) * e
    v = jnp.einsum("bne,bed->bnd", H, e, precision=hp)
    dv = jnp.sum(H, axis=2, keepdims=True)
    v = jnp.where(dv == 0.0, 0.0, 1.0 / dv) * v
    return v


if __name__ == "__main__":
    # Deliberately non-128-aligned shapes to exercise the padding/slicing path.
    B, N, E, C1, C2 = 2, 200, 96, 48, 80

    key = jax.random.PRNGKey(0)
    kx, kh, kw, kb = jax.random.split(key, 4)

    x = jax.random.normal(kx, (B, N, C1), dtype=jnp.float32)
    # 0/1 incidence matrix (node -> hyperedge).
    H = jax.random.bernoulli(kh, p=0.3, shape=(B, N, E)).astype(jnp.float32)
    # Force an empty hyperedge and an isolated node to exercise the inf -> 0 path.
    H = H.at[0, :, 0].set(0.0)
    H = H.at[0, 5, :].set(0.0)

    # fc = nn.Linear(c1, c2): PyTorch weight is [c2, c1]; we store its transpose.
    w_torch_style = jax.random.normal(kw, (C2, C1), dtype=jnp.float32) * 0.1
    w = w_torch_style.T                               # [C1, C2]
    b = jax.random.normal(kb, (C2,), dtype=jnp.float32) * 0.1

    # --- f32 path ---
    out32 = jax.block_until_ready(hypconv(x, H, w, b))
    ref32 = hypconv_ref(x, H, w, b)
    assert out32.shape == (B, N, C2)
    assert jnp.allclose(out32, ref32, atol=2e-2, rtol=2e-2), "f32 mismatch vs reference"

    # --- bf16 fast path (recommended: H is 0/1 so exact; accumulation is f32) ---
    xb = x.astype(jnp.bfloat16)
    Hb = H.astype(jnp.bfloat16)
    wb = w.astype(jnp.bfloat16)
    outb = jax.block_until_ready(hypconv(xb, Hb, wb, b))
    refb = hypconv_ref(xb.astype(jnp.float32), Hb.astype(jnp.float32),
                       wb.astype(jnp.float32), b)
    assert outb.shape == (B, N, C2)
    assert jnp.allclose(outb.astype(jnp.float32), refb, atol=2e-2, rtol=2e-2), \
        "bf16 mismatch vs reference"

    print("KERNEL_OK")
</pallas_src>

<mosaic_0001>
module attributes {stable_mosaic.version = 11 : i64} {
  func.func @_v2e_kernel(%arg0: i32, %arg1: i32, %arg2: i32, %arg3: memref<1x208x48xf32, #tpu.memory_space<vmem>>, %arg4: memref<1x208x128xf32, #tpu.memory_space<vmem>>, %arg5: memref<48x128xf32, #tpu.memory_space<vmem>>, %arg6: memref<1x128xf32, #tpu.memory_space<vmem>>, %arg7: memref<1x128x128xf32, #tpu.memory_space<vmem>>, %arg8: memref<128x48xf32, #tpu.memory_space<vmem>>, %arg9: memref<128x1xf32, #tpu.memory_space<vmem>>) attributes {dimension_semantics = [#tpu.dimension_semantics<parallel>, #tpu.dimension_semantics<parallel>, #tpu.dimension_semantics<arbitrary>], iteration_bounds = array<i64: 2, 1, 1>, scalar_prefetch = 0 : i64, scratch_operands = 2 : i64, tpu.core_type = #tpu.core_type<tc>, window_params = [{transform_indices = @transform_0, window_bounds = array<i64: 1, 208, 48>}, {transform_indices = @transform_1, window_bounds = array<i64: 1, 208, 128>}, {pipeline_mode = #tpu.pipeline_mode<synchronous>, transform_indices = @transform_2, window_bounds = array<i64: 48, 128>}, {pipeline_mode = #tpu.pipeline_mode<synchronous>, transform_indices = @transform_3, window_bounds = array<i64: 1, 128>}, {transform_indices = @transform_4, window_bounds = array<i64: 1, 128, 128>}]} {
    %c0_i32 = arith.constant 0 : i32
    %0 = arith.cmpi eq, %arg2, %c0_i32 : i32
    %1 = arith.extui %0 : i1 to i32
    %c0_i32_0 = arith.constant 0 : i32
    %2 = arith.cmpi ne, %1, %c0_i32_0 : i32
    scf.if %2 {
      %cst_18 = arith.constant 0.000000e+00 : f32
      %19 = vector.broadcast %cst_18 : f32 to vector<128x48xf32>
      %c0_19 = arith.constant 0 : index
      %c0_20 = arith.constant 0 : index
      %20 = vector.load %arg8[%c0_19, %c0_20] : memref<128x48xf32, #tpu.memory_space<vmem>>, vector<128x48xf32>
      tpu.vector_store %arg8[%c0_19, %c0_20], %19 {strides = array<i32>} : memref<128x48xf32, #tpu.memory_space<vmem>>, vector<128x48xf32>,
      %cst_21 = arith.constant 0.000000e+00 : f32
      %21 = vector.broadcast %cst_21 : f32 to vector<128x1xf32>
      %c0_22 = arith.constant 0 : index
      %c0_23 = arith.constant 0 : index
      %22 = vector.load %arg9[%c0_22, %c0_23] : memref<128x1xf32, #tpu.memory_space<vmem>>, vector<128x1xf32>
      tpu.vector_store %arg9[%c0_22, %c0_23], %21 {strides = array<i32>} : memref<128x1xf32, #tpu.memory_space<vmem>>, vector<128x1xf32>,
    } else {
    }
    %c0 = arith.constant 0 : index
    %c0_1 = arith.constant 0 : index
    %c0_2 = arith.constant 0 : index
    %3 = vector.load %arg4[%c0, %c0_1, %c0_2] : memref<1x208x128xf32, #tpu.memory_space<vmem>>, vector<1x208x128xf32>
    %4 = vector.shape_cast %3 : vector<1x208x128xf32> to vector<208x128xf32>
    %c0_3 = arith.constant 0 : index
    %c0_4 = arith.constant 0 : index
    %5 = vector.load %arg8[%c0_3, %c0_4] : memref<128x48xf32, #tpu.memory_space<vmem>>, vector<128x48xf32>
    %c0_5 = arith.constant 0 : index
    %c0_6 = arith.constant 0 : index
    %c0_7 = arith.constant 0 : index
    %6 = vector.load %arg3[%c0_5, %c0_6, %c0_7] : memref<1x208x48xf32, #tpu.memory_space<vmem>>, vector<1x208x48xf32>
    %7 = vector.shape_cast %6 : vector<1x208x48xf32> to vector<208x48xf32>
    %cst = arith.constant dense<0.000000e+00> : vector<128x48xf32>
    %8 = tpu.matmul %4, %7, %cst {dimension_numbers = #tpu.dot_dimension_numbers<[0], [0], [1], [1], [0, 1, 1, 1], [], []>} : vector<208x128xf32>, vector<208x48xf32>, vector<128x48xf32> -> vector<128x48xf32>
    %9 = arith.addf %5, %8 : vector<128x48xf32>
    %c0_8 = arith.constant 0 : index
    %c0_9 = arith.constant 0 : index
    %10 = vector.load %arg8[%c0_8, %c0_9] : memref<128x48xf32, #tpu.memory_space<vmem>>, vector<128x48xf32>
    tpu.vector_store %arg8[%c0_8, %c0_9], %9 {strides = array<i32>} : memref<128x48xf32, #tpu.memory_space<vmem>>, vector<128x48xf32>,
    %c0_10 = arith.constant 0 : index
    %c0_11 = arith.constant 0 : index
    %11 = vector.load %arg9[%c0_10, %c0_11] : memref<128x1xf32, #tpu.memory_space<vmem>>, vector<128x1xf32>
    %cst_12 = arith.constant 1.000000e+00 : f32
    %12 = vector.broadcast %cst_12 : f32 to vector<208x1xf32>
    %cst_13 = arith.constant dense<0.000000e+00> : vector<128x1xf32>
    %13 = tpu.matmul %4, %12, %cst_13 {dimension_numbers = #tpu.dot_dimension_numbers<[0], [0], [1], [1], [0, 1, 1, 1], [], []>} : vector<208x128xf32>, vector<208x1xf32>, vector<128x1xf32> -> vector<128x1xf32>
    %14 = arith.addf %11, %13 : vector<128x1xf32>
    %c0_14 = arith.constant 0 : index
    %c0_15 = arith.constant 0 : index
    %15 = vector.load %arg9[%c0_14, %c0_15] : memref<128x1xf32, #tpu.memory_space<vmem>>, vector<128x1xf32>
    tpu.vector_store %arg9[%c0_14, %c0_15], %14 {strides = array<i32>} : memref<128x1xf32, #tpu.memory_space<vmem>>, vector<128x1xf32>,
    %c0_i32_16 = arith.constant 0 : i32
    %16 = arith.cmpi eq, %arg2, %c0_i32_16 : i32
    %17 = arith.extui %16 : i1 to i32
    %c0_i32_17 = arith.constant 0 : i32
    %18 = arith.cmpi ne, %17, %c0_i32_17 : i32
    scf.if %18 {
      %c0_18 = arith.constant 0 : index
      %c0_19 = arith.constant 0 : index
      %19 = vector.load %arg9[%c0_18, %c0_19] : memref<128x1xf32, #tpu.memory_space<vmem>>, vector<128x1xf32>
      %cst_20 = arith.constant 0.000000e+00 : f32
      %20 = vector.broadcast %cst_20 : f32 to vector<128x1xf32>
      %21 = arith.cmpf ogt, %19, %20 : vector<128x1xf32>
      %22 = tpu.reciprocal %19 {approx = true} : vector<128x1xf32> -> vector<128x1xf32>
      %cst_21 = arith.constant 0.000000e+00 : f32
      %23 = vector.broadcast %cst_21 : f32 to vector<128x1xf32>
      %24 = arith.select %21, %22, %23 : vector<128x1xi1>, vector<128x1xf32>
      %c0_22 = arith.constant 0 : index
      %c0_23 = arith.constant 0 : index
      %25 = vector.load %arg8[%c0_22, %c0_23] : memref<128x48xf32, #tpu.memory_space<vmem>>, vector<128x48xf32>
      %26 = vector.broadcast %24 : vector<128x1xf32> to vector<128x48xf32>
      %27 = arith.mulf %25, %26 : vector<128x48xf32>
      %c0_24 = arith.constant 0 : index
      %c0_25 = arith.constant 0 : index
      %28 = vector.load %arg5[%c0_24, %c0_25] : memref<48x128xf32, #tpu.memory_space<vmem>>, vector<48x128xf32>
      %cst_26 = arith.constant dense<0.000000e+00> : vector<128x128xf32>
      %29 = tpu.matmul %27, %28, %cst_26 {dimension_numbers = #tpu.dot_dimension_numbers<[1], [0], [0], [1], [0, 0, 1, 1], [], []>} : vector<128x48xf32>, vector<48x128xf32>, vector<128x128xf32> -> vector<128x128xf32>
      %c0_27 = arith.constant 0 : index
      %c0_28 = arith.constant 0 : index
      %30 = vector.load %arg6[%c0_27, %c0_28] : memref<1x128xf32, #tpu.memory_space<vmem>>, vector<1x128xf32>
      %31 = vector.broadcast %30 : vector<1x128xf32> to vector<128x128xf32>
      %32 = arith.addf %29, %31 : vector<128x128xf32>
      %cst_29 = arith.constant 0.000000e+00 : f32
      %33 = vector.shape_cast %21 : vector<128x1xi1> to vector<128x1xi1>
      %34 = vector.broadcast %33 : vector<128x1xi1> to vector<128x128xi1>
      %35 = vector.broadcast %cst_29 : f32 to vector<128x128xf32>
      %36 = arith.select %34, %32, %35 : vector<128x128xi1>, vector<128x128xf32>
      %c0_30 = arith.constant 0 : index
      %c0_31 = arith.constant 0 : index
      %c0_32 = arith.constant 0 : index
      %37 = vector.load %arg7[%c0_30, %c0_31, %c0_32] : memref<1x128x128xf32, #tpu.memory_space<vmem>>, vector<1x128x128xf32>
      %38 = vector.shape_cast %37 : vector<1x128x128xf32> to vector<128x128xf32>
      %39 = vector.shape_cast %36 : vector<128x128xf32> to vector<1x128x128xf32>
      tpu.vector_store %arg7[%c0_30, %c0_31, %c0_32], %39 {strides = array<i32>} : memref<1x128x128xf32, #tpu.memory_space<vmem>>, vector<1x128x128xf32>,
    } else {
    }
    return
  }
  func.func @transform_0(%arg0: i32, %arg1: i32, %arg2: i32) -> (i32, i32, i32) {
    %c0_i32 = arith.constant 0 : i32
    %c0_i32_0 = arith.constant 0 : i32
    return %arg0, %arg2, %c0_i32 : i32, i32, i32
  }
  func.func @transform_1(%arg0: i32, %arg1: i32, %arg2: i32) -> (i32, i32, i32) {
    %c0_i32 = arith.constant 0 : i32
    return %arg0, %arg2, %arg1 : i32, i32, i32
  }
  func.func @transform_2(%arg0: i32, %arg1: i32, %arg2: i32) -> (i32, i32) {
    %c0_i32 = arith.constant 0 : i32
    %c0_i32_0 = arith.constant 0 : i32
    %c0_i32_1 = arith.constant 0 : i32
    return %c0_i32, %c0_i32_0 : i32, i32
  }
  func.func @transform_3(%arg0: i32, %arg1: i32, %arg2: i32) -> (i32, i32) {
    %c0_i32 = arith.constant 0 : i32
    %c0_i32_0 = arith.constant 0 : i32
    %c0_i32_1 = arith.constant 0 : i32
    return %c0_i32, %c0_i32_0 : i32, i32
  }
  func.func @transform_4(%arg0: i32, %arg1: i32, %arg2: i32) -> (i32, i32, i32) {
    %c0_i32 = arith.constant 0 : i32
    %c0_i32_0 = arith.constant 0 : i32
    return %arg0, %arg1, %c0_i32 : i32, i32, i32
  }
}

</mosaic_0001>

<bundles_post_ra>
// kernel: tpu_custom_call.1
= control target key start
LH: loop header
LB: loop body
LE: loop exit
PB: predicated region body
PF: predicated region fallthrough
CT: control target
= control target key end

     0   :  { %9 = vsyncpa [#allocation5], 0  ;;  %s2453_s0 = inlined_call_operand.vmem [shape: f32[2,208,48], index: 0, kind: input, shape index: {}]   ;;  %s2454_s1 = inlined_call_operand.vmem [shape: f32[2,208,128], index: 1, kind: input, shape index: {}]   ;;  %s2455_s2 = inlined_call_operand.vmem [shape: f32[48,128], index: 2, kind: input, shape index: {}]   ;;  %s2456_s3 = inlined_call_operand.vmem [shape: f32[1,128], index: 3, kind: input, shape index: {}]   ;;  %s2457_s4 = inlined_call_operand.hbm [shape: f32[2,128,128], index: 4, kind: output, shape index: {}]  }
   0x1   :  { %11 = vsyncpa [#allocation5 + $0x1], 0  ;;  %s1900_s15 = smov 0   ;;  %s1902_s16 = smov 0  }
   0x2   :  { %s1904_s17 = smov 0   ;;  %s1906_s18 = smov 0  }
   0x3   :  { %s1908_s19 = smov 0   ;;  %s1910_s20 = smov 0  }
   0x4 LB: > { %s1488_s21 = sadd.s32 4294967295, %s1866_s20   ;;  %s1489_s22 = sadd.s32 4294967294, %s1866_s20   ;;  %s1866_s20 = sphi %s1910_s20, %s17_s20   ;;  %s1862_s19 = sphi %s1908_s19, %s2481_s19   ;;  %s1858_s18 = sphi %s1906_s18, %s2480_s18   ;;  %s1854_s17 = sphi %s1904_s17, %s2479_s17   ;;  %s1850_s16 = sphi %s1902_s16, %s2478_s16   ;;  %s1846_s15 = sphi %s1900_s15, %s2477_s15  }
   0x5   : > { %s36_s23 = sadd.s32 1, %s1862_s19  ;;  %s145_s24 = sadd.s32 1, %s1854_s17 }
   0x6   : > { %p38_p0 = scmp.ge.s32.totalorder %s36_s23, 2  ;;  %p155_p1 = scmp.ne.s32.totalorder %s1854_s17, %s1850_s16 }
   0x7   : > { %p156_p2 = scmp.eq.s32.totalorder %s1488_s21, 1  ;;  %p161_p3 = scmp.ne.s32.totalorder %s1850_s16, %s1846_s15 }
   0x8   : > { %s2483_s23 = smov (%p38_p0, %s36_s23), 0  ;;  %p162_p5 = scmp.eq.s32.totalorder %s1489_s22, 1 }
   0x9   : > { %p1940_p4 = por %p156_p2, %p155_p1  ;;  %s140_s26 = ssub.s32 %s1862_s19, %s2483_s23 }
   0xa   : > { %p1492_p6 = scmp.ge.s32.totalorder %s1866_s20, 1  ;;  %p143_p7 = scmp.eq.s32.totalorder %s140_s26, 0 }
   0xb   : > { %p1947_p8 = por %p162_p5, %p161_p3  ;;  %p215_p9 = scmp.lt.s32.totalorder %s1866_s20, 3 }
   0xc   : > { %s1953_s28 = scalar_select %p143_p7, %s1854_s17, %s145_s24  }
   0xd   : > { %p216_p10 = pnand %p1492_p6, %p215_p9 }
   0xe   : > { %p258_p11 = scmp.lt.s32.totalorder (!%p216_p10), %s1858_s18, 1  ;;  %v1868_v0 = vmov (!%p216_p10), 0.0|0.0   ;;  %v1869_v1 = vmov (!%p216_p10), 1.0|1.0   ;;  %vm2458_vm0 = vcmask (!%p216_p10), 392192   ;;  %vm451_vm1 = vcmask (!%p216_p10), 654336  }
   0xf   : > { %219 = sbr.rel (%p216_p10) target bundleno = 814 (0x32e), region = 36  ;;  %1609 = vmatprep.subr.bf16.mxu0 (!%p216_p10), %v1868_v0  ;;  %1648 = vmatprep.subr.bf16.mxu1 (!%p216_p10), %v1868_v0  ;;  %vm302_vm2 = vcmask (!%p216_p10), 7168   ;;  %s1550_s12 = sshll.u32 (!%p216_p10), %s1858_s18, 11 }
  0x10   : > { %1649 = vmatpush1.bf16.msra.mxu1 (!%p216_p10), %v1869_v1  ;;  %s2399_s22 = scalar_lea.hbm (!%p216_p10), %s2457_s4, %s1550_s12  ;;  %s1872_s26 = smov (!%p216_p10), [#allocation4]  }
  0x11   : > { %1650 = vmatprep.subr.bf16.mxu1 (!%p216_p10), %v1868_v0 }
  0x14   : > { %1651 = vmatpush1.bf16.msra.mxu1 (!%p216_p10), %v1869_v1 }
  0x15   : > { %1652 = vmatprep.subr.bf16.mxu1 (!%p216_p10), %v1868_v0 }
  0x16   : > { %s259_s29 = scalar_select %p258_p11, %s1858_s18, 1 }
  0x18   : > { %s1692_s30 = smul.u32 208, %s259_s29  ;;  %1653 = vmatpush1.bf16.msra.mxu1 %v1869_v1  ;;  %s1792_s29 = sshll.u32 %s1872_s26, 4  ;;  %s1793_s29 = int_to_ptr.vmem [resolvable:$false] %s1792_s29 }
  0x19   : > { %1654 = vmatprep.subr.bf16.mxu1 %v1868_v0 }
  0x1a   : > { %s1964_s7 = scalar_lea.vmem %s2454_s1, %s1692_s30  ;;  %s1977_s10 = scalar_lea.vmem %s2453_s0, %s1692_s30 }
  0x1b   : > { %v335_v2 = vld [vmem:[%s1964_s7 + $0x80] sm:$0xff]  ;;  %v336_v4 = vld [vmem:[%s1964_s7 + $0x88] sm:$0xff]  ;;  %v337_v6 = vld [vmem:[%s1964_s7 + $0x90] sm:$0xff]  ;;  %s1794_s30 = scalar_lea.vmem %s1793_s29, 4096 }
  0x1c   : > { %v319_v3 = vld [vmem:[%s1964_s7] sm:$0xff]  ;;  %419 = vxpose.xlu0.b32.start [1/10] (short) %v335_v2, 128  ;;  %v320_v5 = vld [vmem:[%s1964_s7 + $0x8] sm:$0xff]  ;;  %v321_v7 = vld [vmem:[%s1964_s7 + $0x10] sm:$0xff]  ;;  %1655 = vmatpush1.bf16.msra.mxu1 %v1869_v1 }
  0x1d   : > { %387 = vxpose.xlu1.b32.start [1/16] %v319_v3, 128  ;;  %v361_v8 = vld [vmem:[%s1977_s10] sm:$0xff]  ;;  %1656 = vmatprep.subr.bf16.mxu1 %v1868_v0  ;;  %v362_v9 = vld [vmem:[%s1977_s10 + $0x8] sm:$0xff]  ;;  %v363_v10 = vld [vmem:[%s1977_s10 + $0x10] sm:$0xff] }
  0x1e   : > { %v364_v11 = vld [vmem:[%s1977_s10 + $0x18] sm:$0xff]  ;;  %v1610_v14 = vpack.c.bf16 %v362_v9, %v361_v8  ;;  %v365_v16 = vld [vmem:[%s1977_s10 + $0x20] sm:$0xff]  ;;  %v366_v17 = vld [vmem:[%s1977_s10 + $0x28] sm:$0xff] }
  0x1f   : > { %v338_v12 = vld [vmem:[%s1964_s7 + $0x98] sm:$0xff]  ;;  %v1613_v15 = vpack.c.bf16 %v364_v11, %v363_v10  ;;  %v339_v18 = vld [vmem:[%s1964_s7 + $0xa0] sm:$0xff]  ;;  %v1616_v20 = vpack.c.bf16 %v366_v17, %v365_v16  ;;  %v367_v21 = vld [vmem:[%s1977_s10 + $0x30] sm:$0xff] }
  0x20   : > { %420 = vxpose.xlu0.b32.cont [2/10] (short) %v336_v4, 128  ;;  %v322_v13 = vld [vmem:[%s1964_s7 + $0x18] sm:$0xff]  ;;  %1657 = vmatpush1.bf16.msra.mxu1 %v1869_v1  ;;  %v323_v19 = vld [vmem:[%s1964_s7 + $0x20] sm:$0xff]  ;;  %v340_v23 = vld [vmem:[%s1964_s7 + $0xa8] sm:$0xff]  ;;  %v1870_v4 = vmov 0.0  }
  0x21   : > { %388 = vxpose.xlu1.b32.cont [2/16] %v320_v5, 128  ;;  %1611 = vmatpush1.bf16.msra.mxu0 %v1610_v14  ;;  %v368_v22 = vld [vmem:[%s1977_s10 + $0x38] sm:$0xff]  ;;  %v324_v24 = vld [vmem:[%s1964_s7 + $0x28] sm:$0xff]  ;;  %v369_v26 = vld [vmem:[%s1977_s10 + $0x40] sm:$0xff]  ;;  %286 = vst.msk [vmem:[#allocation2] sm:$0xff] %vm2458_vm0, %v1870_v4 }
  0x22   : > { %1658 = vmatprep.subr.bf16.mxu1 %v1868_v0  ;;  %1612 = vmatprep.subr.bf16.mxu0 %v1868_v0  ;;  %v1619_v25 = vpack.c.bf16 %v368_v22, %v367_v21  ;;  %v370_v27 = vld [vmem:[%s1977_s10 + $0x48] sm:$0xff]  ;;  %v341_v28 = vld [vmem:[%s1964_s7 + $0xb0] sm:$0xff]  ;;  %v372_v32 = vld [vmem:[%s1977_s10 + $0x58] sm:$0xff]  ;;  %287 = vst.msk [vmem:[#allocation2 + $0x8] sm:$0xff] %vm2458_vm0, %v1870_v4 }
  0x23   : > { %v325_v29 = vld [vmem:[%s1964_s7 + $0x30] sm:$0xff]  ;;  %v1622_v30 = vpack.c.bf16 %v370_v27, %v369_v26  ;;  %v342_v33 = vld [vmem:[%s1964_s7 + $0xb8] sm:$0xff]  ;;  %v373_v36 = vld [vmem:[%s1977_s10 + $0x60] sm:$0xff]  ;;  %288 = vst.msk [vmem:[#allocation2 + $0x10] sm:$0xff] %vm2458_vm0, %v1870_v4 }
  0x24   : > { %421 = vxpose.xlu0.b32.cont [3/10] (short) %v337_v6, 128  ;;  %1659 = vmatpush1.bf16.msra.mxu1 %v1869_v1  ;;  %v371_v31 = vld [vmem:[%s1977_s10 + $0x50] sm:$0xff]  ;;  %v326_v34 = vld [vmem:[%s1964_s7 + $0x38] sm:$0xff]  ;;  %v374_v37 = vld [vmem:[%s1977_s10 + $0x68] sm:$0xff]  ;;  %289 = vst.msk [vmem:[#allocation2 + $0x18] sm:$0xff] %vm2458_vm0, %v1870_v4 }
  0x25   : > { %389 = vxpose.xlu1.b32.cont [3/16] %v321_v7, 128  ;;  %1614 = vmatpush1.bf16.msra.mxu0 %v1613_v15  ;;  %v1625_v35 = vpack.c.bf16 %v372_v32, %v371_v31  ;;  %v343_v38 = vld [vmem:[%s1964_s7 + $0xc0] sm:$0xff]  ;;  %v1628_v40 = vpack.c.bf16 %v374_v37, %v373_v36  ;;  %v375_v41 = vld [vmem:[%s1977_s10 + $0x70] sm:$0xff]  ;;  %v376_v42 = vld [vmem:[%s1977_s10 + $0x78] sm:$0xff]  ;;  %290 = vst.msk [vmem:[#allocation2 + $0x20] sm:$0xff] %vm2458_vm0, %v1870_v4  ;;  %v1871_v36 = vmov 0  }
  0x26   : > { %1660 = vmatprep.subr.bf16.mxu1 %v1868_v0  ;;  %1615 = vmatprep.subr.bf16.mxu0 %v1868_v0  ;;  %v327_v39 = vld [vmem:[%s1964_s7 + $0x40] sm:$0xff]  ;;  %v344_v43 = vld [vmem:[%s1964_s7 + $0xc8] sm:$0xff]  ;;  %v1631_v45 = vpack.c.bf16 %v376_v42, %v375_v41  ;;  %v329_v48 = vld [vmem:[%s1964_s7 + $0x50] sm:$0xff]  ;;  %291 = vst.msk [vmem:[#allocation2 + $0x28] sm:$0xff] %vm2458_vm0, %v1870_v4 }
  0x27   : > { %v328_v44 = vld [vmem:[%s1964_s7 + $0x48] sm:$0xff]  ;;  %v377_v46 = vld [vmem:[%s1977_s10 + $0x80] sm:$0xff]  ;;  %v379_v50 = vld [vmem:[%s1977_s10 + $0x90] sm:$0xff]  ;;  %292 = vst.msk [vmem:[#allocation2 + $0x30] sm:$0xff] %vm2458_vm0, %v1870_v4 }
  0x28   : > { %422 = vxpose.xlu0.b32.cont [4/10] (short) %v338_v12, 128  ;;  %1661 = vmatpush1.bf16.msra.mxu1 %v1869_v1  ;;  %v378_v47 = vld [vmem:[%s1977_s10 + $0x88] sm:$0xff]  ;;  %v380_v51 = vld [vmem:[%s1977_s10 + $0x98] sm:$0xff]  ;;  %v381_v54 = vld [vmem:[%s1977_s10 + $0xa0] sm:$0xff]  ;;  %293 = vst.msk [vmem:[#allocation2 + $0x38] sm:$0xff] %vm2458_vm0, %v1870_v4 }
  0x29   : > { %390 = vxpose.xlu1.b32.cont [4/16] %v322_v13, 128  ;;  %1617 = vmatpush1.bf16.msra.mxu0 %v1616_v20  ;;  %v1634_v49 = vpack.c.bf16 %v378_v47, %v377_v46  ;;  %v330_v52 = vld [vmem:[%s1964_s7 + $0x58] sm:$0xff]  ;;  %v1637_v53 = vpack.c.bf16 %v380_v51, %v379_v50  ;;  %v382_v55 = vld [vmem:[%s1977_s10 + $0xa8] sm:$0xff]  ;;  %v331_v56 = vld [vmem:[%s1964_s7 + $0x60] sm:$0xff]  ;;  %294 = vst.msk [vmem:[#allocation2 + $0x40] sm:$0xff] %vm2458_vm0, %v1870_v4 }
  0x2a   : > { %1662 = vmatprep.subr.bf16.mxu1 %v1868_v0  ;;  %1618 = vmatprep.subr.bf16.mxu0 %v1868_v0  ;;  %v1640_v57 = vpack.c.bf16 %v382_v55, %v381_v54  ;;  %v383_v58 = vld [vmem:[%s1977_s10 + $0xb0] sm:$0xff]  ;;  %v384_v59 = vld [vmem:[%s1977_s10 + $0xb8] sm:$0xff]  ;;  %v332_v60 = vld [vmem:[%s1964_s7 + $0x68] sm:$0xff]  ;;  %295 = vst.msk [vmem:[#allocation2 + $0x48] sm:$0xff] %vm2458_vm0, %v1870_v4 }
  0x2b   : > { %v1643_v61 = vpack.c.bf16 %v384_v59, %v383_v58  ;;  %v385_v62 = vld [vmem:[%s1977_s10 + $0xc0] sm:$0xff]  ;;  %v386_v63 = vld [vmem:[%s1977_s10 + $0xc8] sm:$0xff]  ;;  %v334_v3 = vld [vmem:[%s1964_s7 + $0x78] sm:$0xff]  ;;  %296 = vst.msk [vmem:[#allocation2 + $0x50] sm:$0xff] %vm2458_vm0, %v1870_v4 }
  0x2c   : > { %423 = vxpose.xlu0.b32.cont [5/10] (short) %v339_v18, 128  ;;  %1663 = vmatpush1.bf16.msra.mxu1 %v1869_v1  ;;  %v1646_v2 = vpack.c.bf16 %v386_v63, %v385_v62  ;;  %297 = vst.msk [vmem:[#allocation2 + $0x58] sm:$0xff] %vm2458_vm0, %v1870_v4  ;;  %298 = vst.msk [vmem:[#allocation2 + $0x60] sm:$0xff] %vm2458_vm0, %v1870_v4  ;;  %v1051_v37 = vld [vmem:[%s2455_s2] sm:$0xff]  ;;  %v1054_v41 = vld [vmem:[%s2455_s2 + $0x18] sm:$0xff] }
  0x2d   : > { %391 = vxpose.xlu1.b32.cont [5/16] %v323_v19, 128  ;;  %1620 = vmatpush1.bf16.msra.mxu0 %v1619_v25  ;;  %299 = vst.msk [vmem:[#allocation2 + $0x68] sm:$0xff] %vm2458_vm0, %v1870_v4  ;;  %300 = vst.msk [vmem:[#allocation2 + $0x70] sm:$0xff] %vm2458_vm0, %v1870_v4  ;;  %v346_v51 = vld [vmem:[#allocation2 + $0x8] sm:$0xff]  ;;  %v347_v59 = vld [vmem:[#allocation2 + $0x10] sm:$0xff] }
  0x2e   : > { %1664 = vmatprep.subr.bf16.mxu1 %v1868_v0  ;;  %1621 = vmatprep.subr.bf16.mxu0 %v1868_v0  ;;  %301 = vst.msk [vmem:[#allocation2 + $0x78] sm:$0xff] %vm2458_vm0, %v1870_v4 }
  0x2f   : > { %303 = vst.msk [vmem:[#allocation3] sm:$0xff] %vm302_vm2, %v1870_v4  ;;  %304 = vst.msk [vmem:[#allocation3 + $0x8] sm:$0xff] %vm302_vm2, %v1870_v4 }
  0x30   : > { %424 = vxpose.xlu0.b32.cont [6/10] (short) %v340_v23, 128  ;;  %1665 = vmatpush1.bf16.msra.mxu1 %v1869_v1  ;;  %305 = vst.msk [vmem:[#allocation3 + $0x10] sm:$0xff] %vm302_vm2, %v1870_v4  ;;  %306 = vst.msk [vmem:[#allocation3 + $0x18] sm:$0xff] %vm302_vm2, %v1870_v4 }
  0x31   : > { %392 = vxpose.xlu1.b32.cont [6/16] %v324_v24, 128  ;;  %1623 = vmatpush1.bf16.msra.mxu0 %v1622_v30  ;;  %307 = vst.msk [vmem:[#allocation3 + $0x20] sm:$0xff] %vm302_vm2, %v1870_v4  ;;  %308 = vst.msk [vmem:[#allocation3 + $0x28] sm:$0xff] %vm302_vm2, %v1870_v4 }
  0x32   : > { %1666 = vmatprep.subr.bf16.mxu1 %v1868_v0  ;;  %1624 = vmatprep.subr.bf16.mxu0 %v1868_v0  ;;  %309 = vst.msk [vmem:[#allocation3 + $0x30] sm:$0xff] %vm302_vm2, %v1870_v4  ;;  %310 = vst.msk [vmem:[#allocation3 + $0x38] sm:$0xff] %vm302_vm2, %v1870_v4 }
  0x33   : > { %311 = vst.msk [vmem:[#allocation3 + $0x40] sm:$0xff] %vm302_vm2, %v1870_v4  ;;  %312 = vst.msk [vmem:[#allocation3 + $0x48] sm:$0xff] %vm302_vm2, %v1870_v4 }
  0x34   : > { %425 = vxpose.xlu0.b32.cont [7/10] (short) %v341_v28, 128  ;;  %1667 = vmatpush1.bf16.msra.mxu1 %v1869_v1  ;;  %313 = vst.msk [vmem:[#allocation3 + $0x50] sm:$0xff] %vm302_vm2, %v1870_v4  ;;  %314 = vst.msk [vmem:[#allocation3 + $0x58] sm:$0xff] %vm302_vm2, %v1870_v4 }
  0x35   : > { %393 = vxpose.xlu1.b32.cont [7/16] %v325_v29, 128  ;;  %1626 = vmatpush1.bf16.msra.mxu0 %v1625_v35  ;;  %315 = vst.msk [vmem:[#allocation3 + $0x60] sm:$0xff] %vm302_vm2, %v1870_v4  ;;  %316 = vst.msk [vmem:[#allocation3 + $0x68] sm:$0xff] %vm302_vm2, %v1870_v4 }
  0x36   : > { %1668 = vmatprep.subr.bf16.mxu1 %v1868_v0  ;;  %1627 = vmatprep.subr.bf16.mxu0 %v1868_v0  ;;  %317 = vst.msk [vmem:[#allocation3 + $0x70] sm:$0xff] %vm302_vm2, %v1870_v4  ;;  %318 = vst.msk [vmem:[#allocation3 + $0x78] sm:$0xff] %vm302_vm2, %v1870_v4  ;;  %v348_v4 = vld [vmem:[#allocation2 + $0x18] sm:$0xff] }
  0x38   : > { %426 = vxpose.xlu0.b32.cont [8/10] (short) %v342_v33, 128  ;;  %1669 = vmatpush1.bf16.msra.mxu1 %v1869_v1 }
  0x39   : > { %394 = vxpose.xlu1.b32.cont [8/16] %v326_v34, 128  ;;  %1629 = vmatpush1.bf16.msra.mxu0 %v1628_v40 }
  0x3a   : > { %1670 = vmatprep.subr.bf16.mxu1 %v1868_v0  ;;  %1630 = vmatprep.subr.bf16.mxu0 %v1868_v0 }
  0x3c   : > { %427 = vxpose.xlu0.b32.cont [9/10] (short) %v343_v38, 128  ;;  %1671 = vmatpush1.bf16.msra.mxu1 %v1869_v1  ;;  %v1052_v38 = vld [vmem:[%s2455_s2 + $0x8] sm:$0xff] }
  0x3d   : > { %395 = vxpose.xlu1.b32.cont [9/16] %v327_v39, 128  ;;  %1632 = vmatpush1.bf16.msra.mxu0 %v1631_v45  ;;  %v1053_v39 = vld [vmem:[%s2455_s2 + $0x10] sm:$0xff]  ;;  %v1674_v40 = vpack.c.bf16 %v1052_v38, %v1051_v37  ;;  %v1056_v37 = vld [vmem:[%s2455_s2 + $0x28] sm:$0xff] }
  0x3e   : > { %1672 = vmatprep.subr.bf16.mxu1 %v1868_v0  ;;  %1633 = vmatprep.subr.bf16.mxu0 %v1868_v0  ;;  %v1678_v42 = vpack.c.bf16 %v1054_v41, %v1053_v39 }
  0x40   : > { %428 = vxpose.xlu0.b32.end [10/10] (short) %v344_v43, 128  ;;  %1673 = vmatpush1.bf16.msra.mxu1 %v1869_v1  ;;  %v333_v1 = vld [vmem:[%s1964_s7 + $0x70] sm:$0xff]  ;;  %v345_v43 = vld [vmem:[#allocation2] sm:$0xff]  ;;  %s254_s7 = sand.u32 1, %s1850_s16  }
  0x41   : > { %396 = vxpose.xlu1.b32.cont [10/16] %v328_v44, 128  ;;  %1635 = vmatpush1.bf16.msra.mxu0 %v1634_v49  ;;  %v678_v44 = vld [vmem:[#allocation3] sm:$0xff]  ;;  %s1493_s8 = sshll.u32 %s254_s7, 7  ;;  %s2407_s18 = scalar_lea.sflag [#allocation5], %s254_s7 }
  0x42   : > { %1636 = vmatprep.subr.bf16.mxu0 %v1868_v0  ;;  %1686 = vmatprep.subr.bf16.mxu1 %v1674_v40  ;;  %s2364_s11 = scalar_lea.vmem [#allocation4], %s1493_s8 }
  0x43   : > { %s1385_s13 = sshll.u32 %s2364_s11, 4  ;;  %s2401_s13 = int_to_ptr.vmem [resolvable:$true] %s1385_s13 }
  0x44   : > { %s1788_s24 = scalar_lea.vmem %s2401_s13, 2048  ;;  %p1795_p1 = scmp.lt.s32.totalorder %s2401_s13, %s1793_s29 }
  0x45   : > { %397 = vxpose.xlu1.b32.cont [11/16] %v329_v48, 128  ;;  %1638 = vmatpush1.bf16.msra.mxu0 %v1637_v53  ;;  %p1789_p12 = scmp.ne.s32.totalorder %s2401_s13, %s1788_s24  ;;  %p1796_p2 = scmp.lt.s32.totalorder %s1794_s30, %s1788_s24 }
  0x46   : > { %1639 = vmatprep.subr.bf16.mxu0 %v1868_v0 }
  0x47   : > { %p1790_p13 = pnand %p1789_p12, %p1940_p4  ;;  %p1797_p3 = por %p1796_p2, %p1795_p1 }
  0x49   : > { %398 = vxpose.xlu1.b32.cont [12/16] %v330_v52, 128  ;;  %1641 = vmatpush1.bf16.msra.mxu0 %v1640_v57  ;;  %v679_v52 = vld [vmem:[#allocation3 + $0x8] sm:$0xff]  ;;  %p1791_p0 = pneg %p1790_p13 }
  0x4a   : > { %1642 = vmatprep.subr.bf16.mxu0 %v1868_v0 }
  0x4b   : > { %p1798_p5 = pnand %p1797_p3, %p1791_p0 }
  0x4d   : > { %399 = vxpose.xlu1.b32.cont [13/16] %v331_v56, 128  ;;  %1644 = vmatpush1.bf16.msra.mxu0 %v1643_v61 }
  0x4e   : > { %1645 = vmatprep.subr.bf16.mxu0 %v1868_v0 }
  0x51   : > { %400 = vxpose.xlu1.b32.cont [14/16] %v332_v60, 128  ;;  %1647 = vmatpush1.bf16.msra.mxu0 %v1646_v2  ;;  %v680_v60 = vld [vmem:[#allocation3 + $0x10] sm:$0xff] }
  0x52   : > { %1675 = vmatprep.subr.bf16.mxu0 %v1674_v40 }
  0x55   : > { %401 = vxpose.xlu1.b32.cont [15/16] %v333_v1, 128 }
  0x59   : > { %402 = vxpose.xlu1.b32.end [16/16] %v334_v3, 128 }
  0x69   : > { %1754 = vset.pattern.permute.xlu0 %v1871_v36 }
  0x77   : > { %1755 = vset.pattern.permute.xlu1 %v1871_v36 }
  0x9c   : > { %v435_v0 = vpop.trf.xlu0 }
  0x9d   : > { %v403_v5 = vpop.trf.xlu1  ;;  %1496 = vmatprep.mubr.msk.f32.mxu0 %vm451_vm1, %v435_v0  ;;  %1512 = vmatprep.mubr.msk.f32.mxu1 %vm451_vm1, %v435_v0  ;;  %v681_v0 = vld [vmem:[#allocation3 + $0x18] sm:$0xff] }
  0x9e   : > { %565 = vmatmul.mubr.f32.vlgmr.msra.gmra.mrb[0].mxu0 %v403_v5  ;;  %759 = vmatmul.mubr.f32.vlgmr.msra.gmra.mrb[0].mxu1 %v403_v5 }
  0x9f   : > { %1677 = vmatpush3.bf16.msra.mxu0 %v1674_v40  ;;  %1689 = vmatpush3.bf16.msra.mxu1 %v1674_v40 }
  0xa0   : > { %v436_v6 = vpop.trf.xlu0  ;;  %1679 = vmatprep.subr.bf16.mxu0 %v1678_v42  ;;  %1687 = vmatprep.subr.bf16.mxu1 %v1678_v42 }
  0xa1   : > { %v404_v7 = vpop.trf.xlu1  ;;  %1513 = vmatprep.mubr.msk.f32.mxu1 %vm451_vm1, %v436_v6  ;;  %1497 = vmatprep.mubr.msk.f32.mxu0 %vm451_vm1, %v436_v6 }
  0xa2   : > { %570 = vmatmul.mubr.f32.gmra.mrb[2].mxu0 %v404_v7  ;;  %764 = vmatmul.mubr.f32.gmra.mrb[2].mxu1 %v404_v7 }
  0xa3   : > { %1681 = vmatpush3.bf16.msra.mxu0 %v1678_v42  ;;  %1690 = vmatpush3.bf16.msra.mxu1 %v1678_v42 }
  0xa4   : > { %v437_v8 = vpop.trf.xlu0 }
  0xa5   : > { %v405_v9 = vpop.trf.xlu1  ;;  %1514 = vmatprep.mubr.msk.f32.mxu1 %vm451_vm1, %v437_v8  ;;  %1498 = vmatprep.mubr.msk.f32.mxu0 %vm451_vm1, %v437_v8 }
  0xa6   : > { %575 = vmatmul.mubr.f32.gmra.mrb[4].mxu0 %v405_v9  ;;  %769 = vmatmul.mubr.f32.gmra.mrb[4].mxu1 %v405_v9 }
  0xa8   : > { %v438_v10 = vpop.trf.xlu0 }
  0xa9   : > { %v406_v11 = vpop.trf.xlu1  ;;  %1515 = vmatprep.mubr.msk.f32.mxu1 %vm451_vm1, %v438_v10  ;;  %1499 = vmatprep.mubr.msk.f32.mxu0 %vm451_vm1, %v438_v10 }
  0xaa   : > { %580 = vmatmul.mubr.f32.gmra.mrb[6].mxu0 %v406_v11  ;;  %774 = vmatmul.mubr.f32.gmra.mrb[6].mxu1 %v406_v11 }
  0xac   : > { %v439_v12 = vpop.trf.xlu0 }
  0xad   : > { %v407_v13 = vpop.trf.xlu1  ;;  %1516 = vmatprep.mubr.msk.f32.mxu1 %vm451_vm1, %v439_v12  ;;  %1500 = vmatprep.mubr.msk.f32.mxu0 %vm451_vm1, %v439_v12  ;;  %v349_v12 = vld [vmem:[#allocation2 + $0x20] sm:$0xff] }
  0xae   : > { %585 = vmatmul.mubr.f32.gmra.mrb[8].mxu0 %v407_v13  ;;  %779 = vmatmul.mubr.f32.gmra.mrb[8].mxu1 %v407_v13  ;;  %v682_v13 = vld [vmem:[#allocation3 + $0x20] sm:$0xff] }
  0xb0   : > { %v440_v14 = vpop.trf.xlu0 }
  0xb1   : > { %v408_v15 = vpop.trf.xlu1  ;;  %1517 = vmatprep.mubr.msk.f32.mxu1 %vm451_vm1, %v440_v14  ;;  %1501 = vmatprep.mubr.msk.f32.mxu0 %vm451_vm1, %v440_v14 }
  0xb2   : > { %590 = vmatmul.mubr.f32.gmra.mrb[10].mxu0 %v408_v15  ;;  %784 = vmatmul.mubr.f32.gmra.mrb[10].mxu1 %v408_v15 }
  0xb4   : > { %v441_v16 = vpop.trf.xlu0 }
  0xb5   : > { %v409_v17 = vpop.trf.xlu1  ;;  %1518 = vmatprep.mubr.msk.f32.mxu1 %vm451_vm1, %v441_v16  ;;  %1502 = vmatprep.mubr.msk.f32.mxu0 %vm451_vm1, %v441_v16 }
  0xb6   : > { %595 = vmatmul.mubr.f32.gmra.mrb[12].mxu0 %v409_v17  ;;  %789 = vmatmul.mubr.f32.gmra.mrb[12].mxu1 %v409_v17 }
  0xb8   : > { %v442_v18 = vpop.trf.xlu0 }
  0xb9   : > { %v410_v19 = vpop.trf.xlu1  ;;  %1519 = vmatprep.mubr.msk.f32.mxu1 %vm451_vm1, %v442_v18  ;;  %1503 = vmatprep.mubr.msk.f32.mxu0 %vm451_vm1, %v442_v18 }
  0xba   : > { %600 = vmatmul.mubr.f32.gmra.mrb[14].mxu0 %v410_v19  ;;  %794 = vmatmul.mubr.f32.gmra.mrb[14].mxu1 %v410_v19 }
  0xbc   : > { %v443_v20 = vpop.trf.xlu0 }
  0xbd   : > { %v411_v21 = vpop.trf.xlu1  ;;  %1520 = vmatprep.mubr.msk.f32.mxu1 %vm451_vm1, %v443_v20  ;;  %1504 = vmatprep.mubr.msk.f32.mxu0 %vm451_vm1, %v443_v20 }
  0xbe   : > { %605 = vmatmul.mubr.f32.gmra.mrb[16].mxu0 %v411_v21  ;;  %799 = vmatmul.mubr.f32.gmra.mrb[16].mxu1 %v411_v21  ;;  %v350_v21 = vld [vmem:[#allocation2 + $0x28] sm:$0xff] }
  0xc0   : > { %v444_v22 = vpop.trf.xlu0 }
  0xc1   : > { %v412_v23 = vpop.trf.xlu1  ;;  %1521 = vmatprep.mubr.msk.f32.mxu1 %vm451_vm1, %v444_v22  ;;  %1505 = vmatprep.mubr.msk.f32.mxu0 %vm451_vm1, %v444_v22  ;;  %v683_v22 = vld [vmem:[#allocation3 + $0x28] sm:$0xff] }
  0xc2   : > { %610 = vmatmul.mubr.f32.gmra.mrb[18].mxu0 %v412_v23  ;;  %804 = vmatmul.mubr.f32.gmra.mrb[18].mxu1 %v412_v23 }
  0xc4   : > { %v445_v24 = vpop.trf.xlu0 }
  0xc5   : > { %v413_v25 = vpop.trf.xlu1  ;;  %1522 = vmatprep.mubr.msk.f32.mxu1 %vm451_vm1, %v445_v24  ;;  %1506 = vmatprep.mubr.msk.f32.mxu0 %vm451_vm1, %v445_v24 }
  0xc6   : > { %615 = vmatmul.mubr.f32.gmra.mrb[20].mxu0 %v413_v25  ;;  %809 = vmatmul.mubr.f32.gmra.mrb[20].mxu1 %v413_v25 }
  0xc8   : > { %v446_v26 = vpop.trf.xlu0 }
  0xc9   : > { %v414_v27 = vpop.trf.xlu1  ;;  %1523 = vmatprep.mubr.msk.f32.mxu1 %vm451_vm1, %v446_v26  ;;  %1507 = vmatprep.mubr.msk.f32.mxu0 %vm451_vm1, %v446_v26 }
  0xca   : > { %620 = vmatmul.mubr.f32.gmra.mrb[22].mxu0 %v414_v27  ;;  %814 = vmatmul.mubr.f32.gmra.mrb[22].mxu1 %v414_v27 }
  0xcc   : > { %v447_v28 = vpop.trf.xlu0 }
  0xcd   : > { %v415_v29 = vpop.trf.xlu1  ;;  %1524 = vmatprep.mubr.msk.f32.mxu1 %vm451_vm1, %v447_v28  ;;  %1508 = vmatprep.mubr.msk.f32.mxu0 %vm451_vm1, %v447_v28 }
  0xce   : > { %625 = vmatmul.mubr.f32.gmra.mrb[24].mxu0 %v415_v29  ;;  %819 = vmatmul.mubr.f32.gmra.mrb[24].mxu1 %v415_v29 }
  0xd0   : > { %v448_v30 = vpop.trf.xlu0 }
  0xd1   : > { %v416_v31 = vpop.trf.xlu1  ;;  %1525 = vmatprep.mubr.msk.f32.mxu1 %vm451_vm1, %v448_v30  ;;  %1509 = vmatprep.mubr.msk.f32.mxu0 %vm451_vm1, %v448_v30 }
  0xd2   : > { %630 = vmatmul.mubr.f32.gmra.mrb[26].mxu0 %v416_v31  ;;  %824 = vmatmul.mubr.f32.gmra.mrb[26].mxu1 %v416_v31  ;;  %v351_v31 = vld [vmem:[#allocation2 + $0x30] sm:$0xff] }
  0xd4   : > { %v449_v32 = vpop.trf.xlu0 }
  0xd5   : > { %v417_v33 = vpop.trf.xlu1  ;;  %1526 = vmatprep.mubr.msk.f32.mxu1 %vm451_vm1, %v449_v32  ;;  %1510 = vmatprep.mubr.msk.f32.mxu0 %vm451_vm1, %v449_v32  ;;  %v684_v32 = vld [vmem:[#allocation3 + $0x30] sm:$0xff] }
  0xd6   : > { %635 = vmatmul.mubr.f32.gmra.mrb[28].mxu0 %v417_v33  ;;  %829 = vmatmul.mubr.f32.gmra.mrb[28].mxu1 %v417_v33 }
  0xd8   : > { %v450_v34 = vpop.trf.xlu0 }
  0xd9   : > { %v418_v35 = vpop.trf.xlu1  ;;  %1527 = vmatprep.mubr.msk.f32.mxu1 %vm451_vm1, %v450_v34  ;;  %1511 = vmatprep.mubr.msk.f32.mxu0 %vm451_vm1, %v450_v34 }
  0xda   : > { %640 = vmatmul.mubr.f32.gmra.mrb[30].mxu0 %v418_v35  ;;  %834 = vmatmul.mubr.f32.gmra.mrb[30].mxu1 %v418_v35  ;;  %v1055_v35 = vld [vmem:[%s2455_s2 + $0x20] sm:$0xff] }
  0xdb   : > { %v1682_v38 = vpack.c.bf16 %v1056_v37, %v1055_v35  ;;  %v357_v35 = vld [vmem:[#allocation2 + $0x60] sm:$0xff] }
  0xdc   : > { %v690_v37 = vld [vmem:[#allocation3 + $0x60] sm:$0xff] }
  0xdd   : > { %1683 = vmatprep.subr.bf16.mxu0 %v1682_v38  ;;  %1688 = vmatprep.subr.bf16.mxu1 %v1682_v38 }
  0xde   : > { %1685 = vmatpush3.bf16.msra.mxu0 %v1682_v38  ;;  %1691 = vmatpush3.bf16.msra.mxu1 %v1682_v38 }
 0x171   : > { %v566_v45 = vpop.f32.mrb[0].mxu0  ;;  %v760_v46 = vpop.f32.mrb[0].mxu1 }
 0x172   : > { %v645_v47 = vadd.f32 %v566_v45, %v345_v43  ;;  %v839_v48 = vadd.f32 %v760_v46, %v678_v44  ;;  %v568_v49 = vpop.f32.mrb[1].mxu0  ;;  %v762_v50 = vpop.f32.mrb[1].mxu1 }
 0x174   : > { %662 = vst.msk [vmem:[#allocation2] sm:$0xff] %vm2458_vm0, %v645_v47  ;;  %v352_v47 = vld [vmem:[#allocation2 + $0x38] sm:$0xff] }
 0x175   : > { %856 = vst.msk [vmem:[#allocation3] sm:$0xff] %vm302_vm2, %v839_v48  ;;  %v571_v53 = vpop.f32.mrb[2].mxu0  ;;  %v765_v54 = vpop.f32.mrb[2].mxu1  ;;  %v685_v48 = vld [vmem:[#allocation3 + $0x38] sm:$0xff] }
 0x176   : > { %v646_v55 = vadd.f32 %v571_v53, %v346_v51  ;;  %v840_v56 = vadd.f32 %v765_v54, %v679_v52  ;;  %v573_v57 = vpop.f32.mrb[3].mxu0  ;;  %v767_v58 = vpop.f32.mrb[3].mxu1 }
 0x177   : > { %v353_v58 = vld [vmem:[#allocation2 + $0x40] sm:$0xff] }
 0x178   : > { %663 = vst.msk [vmem:[#allocation2 + $0x8] sm:$0xff] %vm2458_vm0, %v646_v55 }
 0x179   : > { %857 = vst.msk [vmem:[#allocation3 + $0x8] sm:$0xff] %vm302_vm2, %v840_v56  ;;  %v576_v61 = vpop.f32.mrb[4].mxu0  ;;  %v770_v62 = vpop.f32.mrb[4].mxu1 }
 0x17a   : > { %v647_v63 = vadd.f32 %v576_v61, %v347_v59  ;;  %v841_v1 = vadd.f32 %v770_v62, %v680_v60  ;;  %v578_v2 = vpop.f32.mrb[5].mxu0  ;;  %v772_v3 = vpop.f32.mrb[5].mxu1  ;;  %v686_v59 = vld [vmem:[#allocation3 + $0x40] sm:$0xff] }
 0x17c   : > { %v2172_v5 = vld [vmem:[#allocation3] sm:$0xff]  ;;  %664 = vst.msk [vmem:[#allocation2 + $0x10] sm:$0xff] %vm2458_vm0, %v647_v63 }
 0x17d   : > { %858 = vst.msk [vmem:[#allocation3 + $0x10] sm:$0xff] %vm302_vm2, %v841_v1  ;;  %1756 = vrcp.f32 %v2172_v5  ;;  %v581_v6 = vpop.f32.mrb[6].mxu0  ;;  %v775_v7 = vpop.f32.mrb[6].mxu1  ;;  %vm891_vm3 = vcmp.gt.f32.partialorder %v2172_v5, 0.0 }
 0x17e   : > { %v648_v8 = vadd.f32 %v581_v6, %v348_v4  ;;  %v842_v9 = vadd.f32 %v775_v7, %v681_v0  ;;  %v583_v10 = vpop.f32.mrb[7].mxu0  ;;  %v777_v11 = vpop.f32.mrb[7].mxu1  ;;  %v354_v0 = vld [vmem:[#allocation2 + $0x48] sm:$0xff] }
 0x17f   : > { %v687_v6 = vld [vmem:[#allocation3 + $0x48] sm:$0xff] }
 0x180   : > { %v2177_v14 = vld [vmem:[#allocation3 + $0x8] sm:$0xff]  ;;  %665 = vst.msk [vmem:[#allocation2 + $0x18] sm:$0xff] %vm2458_vm0, %v648_v8 }
 0x181   : > { %859 = vst.msk [vmem:[#allocation3 + $0x18] sm:$0xff] %vm302_vm2, %v842_v9  ;;  %1758 = vrcp.f32 %v2177_v14  ;;  %v586_v15 = vpop.f32.mrb[8].mxu0  ;;  %v780_v16 = vpop.f32.mrb[8].mxu1  ;;  %vm892_vm4 = vcmp.gt.f32.partialorder %v2177_v14, 0.0 }
 0x182   : > { %v649_v17 = vadd.f32 %v586_v15, %v349_v12  ;;  %v843_v18 = vadd.f32 %v780_v16, %v682_v13  ;;  %v588_v19 = vpop.f32.mrb[9].mxu0  ;;  %v782_v20 = vpop.f32.mrb[9].mxu1  ;;  %v355_v16 = vld [vmem:[#allocation2 + $0x50] sm:$0xff] }
 0x184   : > { %v2182_v23 = vld [vmem:[#allocation3 + $0x10] sm:$0xff]  ;;  %666 = vst.msk [vmem:[#allocation2 + $0x20] sm:$0xff] %vm2458_vm0, %v649_v17 }
 0x185   : > { %860 = vst.msk [vmem:[#allocation3 + $0x20] sm:$0xff] %vm302_vm2, %v843_v18  ;;  %1760 = vrcp.f32 %v2182_v23  ;;  %v591_v24 = vpop.f32.mrb[10].mxu0  ;;  %v785_v25 = vpop.f32.mrb[10].mxu1  ;;  %vm893_vm5 = vcmp.gt.f32.partialorder %v2182_v23, 0.0  ;;  %v688_v17 = vld [vmem:[#allocation3 + $0x50] sm:$0xff]  ;;  %v1258_v23 = vsel %vm892_vm4, 1, %v1871_v36 }
 0x186   : > { %v650_v27 = vadd.f32 %v591_v24, %v350_v21  ;;  %v844_v28 = vadd.f32 %v785_v25, %v683_v22  ;;  %v593_v29 = vpop.f32.mrb[11].mxu0  ;;  %v787_v30 = vpop.f32.mrb[11].mxu1  ;;  %v356_v25 = vld [vmem:[#allocation2 + $0x58] sm:$0xff] }
 0x187   : > { %v1757_v26 = vpop.eup %1756 }
 0x188   : > { %v923_v33 = vsel %vm891_vm3, %v1757_v26, 0.0  ;;  %v2190_v34 = vld [vmem:[#allocation3 + $0x18] sm:$0xff]  ;;  %667 = vst.msk [vmem:[#allocation2 + $0x28] sm:$0xff] %vm2458_vm0, %v650_v27 }
 0x189   : > { %861 = vst.msk [vmem:[#allocation3 + $0x28] sm:$0xff] %vm302_vm2, %v844_v28  ;;  %957 = vperm.xlu0 %1754, %v923_v33   ;;  %1762 = vrcp.f32 %v2190_v34  ;;  %v596_v39 = vpop.f32.mrb[12].mxu0  ;;  %v790_v40 = vpop.f32.mrb[12].mxu1  ;;  %vm894_vm6 = vcmp.gt.f32.partialorder %v2190_v34, 0.0  ;;  %v689_v26 = vld [vmem:[#allocation3 + $0x58] sm:$0xff] }
 0x18a   : > { %v651_v42 = vadd.f32 %v596_v39, %v351_v31  ;;  %v845_v43 = vadd.f32 %v790_v40, %v684_v32  ;;  %v598_v44 = vpop.f32.mrb[13].mxu0  ;;  %v792_v45 = vpop.f32.mrb[13].mxu1 }
 0x18b   : > { %v1759_v41 = vpop.eup %1758 }
 0x18c   : > { %v924_v46 = vsel %vm892_vm4, %v1759_v41, 0.0  ;;  %v2204_v49 = vld [vmem:[#allocation3 + $0x20] sm:$0xff]  ;;  %668 = vst.msk [vmem:[#allocation2 + $0x30] sm:$0xff] %vm2458_vm0, %v651_v42 }
 0x18d   : > { %862 = vst.msk [vmem:[#allocation3 + $0x30] sm:$0xff] %vm302_vm2, %v845_v43  ;;  %962 = vperm.xlu1 %1755, %v924_v46   ;;  %1764 = vrcp.f32 %v2204_v49  ;;  %v601_v50 = vpop.f32.mrb[14].mxu0  ;;  %v795_v51 = vpop.f32.mrb[14].mxu1  ;;  %vm895_vm7 = vcmp.gt.f32.partialorder %v2204_v49, 0.0  ;;  %v358_v46 = vld [vmem:[#allocation2 + $0x68] sm:$0xff]  ;;  %v1260_v49 = vsel %vm894_vm6, 1, %v1871_v36 }
 0x18e   : > { %v652_v53 = vadd.f32 %v601_v50, %v352_v47  ;;  %v846_v54 = vadd.f32 %v795_v51, %v685_v48  ;;  %v603_v55 = vpop.f32.mrb[15].mxu0  ;;  %v797_v56 = vpop.f32.mrb[15].mxu1  ;;  %v691_v47 = vld [vmem:[#allocation3 + $0x68] sm:$0xff]  ;;  %v1261_v5 = vsel %vm895_vm7, 1, %v1871_v36 }
 0x18f   : > { %v1761_v52 = vpop.eup %1760 }
 0x190   : > { %v925_v57 = vsel %vm893_vm5, %v1761_v52, 0.0  ;;  %669 = vst.msk [vmem:[#allocation2 + $0x38] sm:$0xff] %vm2458_vm0, %v652_v53  ;;  %v2231_v39 = vld [vmem:[#allocation3 + $0x28] sm:$0xff] }
 0x191   : > { %863 = vst.msk [vmem:[#allocation3 + $0x38] sm:$0xff] %vm302_vm2, %v846_v54  ;;  %967 = vperm.xlu1 %1755, %v925_v57   ;;  %v606_v60 = vpop.f32.mrb[16].mxu0  ;;  %v800_v61 = vpop.f32.mrb[16].mxu1  ;;  %vm896_vm10 = vcmp.gt.f32.partialorder %v2231_v39, 0.0 }
 0x192   : > { %v653_v63 = vadd.f32 %v606_v60, %v353_v58  ;;  %v847_v1 = vadd.f32 %v800_v61, %v686_v59  ;;  %v608_v2 = vpop.f32.mrb[17].mxu0  ;;  %v802_v3 = vpop.f32.mrb[17].mxu1  ;;  %v359_v58 = vld [vmem:[#allocation2 + $0x70] sm:$0xff]  ;;  %v1262_v14 = vsel %vm896_vm10, 1, %v1871_v36 }
 0x193   : > { %v1763_v62 = vpop.eup %1762  ;;  %v692_v60 = vld [vmem:[#allocation3 + $0x70] sm:$0xff] }
 0x194   : > { %v926_v4 = vsel %vm894_vm6, %v1763_v62, 0.0  ;;  %670 = vst.msk [vmem:[#allocation2 + $0x40] sm:$0xff] %vm2458_vm0, %v653_v63  ;;  %v2239_v50 = vld [vmem:[#allocation3 + $0x30] sm:$0xff] }
 0x195   : > { %864 = vst.msk [vmem:[#allocation3 + $0x40] sm:$0xff] %vm302_vm2, %v847_v1  ;;  %972 = vperm.xlu1 %1755, %v926_v4   ;;  %v611_v7 = vpop.f32.mrb[18].mxu0  ;;  %v805_v8 = vpop.f32.mrb[18].mxu1  ;;  %vm897_vm12 = vcmp.gt.f32.partialorder %v2239_v50, 0.0 }
 0x196   : > { %v654_v10 = vadd.f32 %v611_v7, %v354_v0  ;;  %v848_v11 = vadd.f32 %v805_v8, %v687_v6  ;;  %v613_v12 = vpop.f32.mrb[19].mxu0  ;;  %v807_v13 = vpop.f32.mrb[19].mxu1  ;;  %v360_v8 = vld [vmem:[#allocation2 + $0x78] sm:$0xff] }
 0x197   : > { %v1765_v9 = vpop.eup %1764 }
 0x198   : > { %v927_v15 = vsel %vm895_vm7, %v1765_v9, 0.0  ;;  %671 = vst.msk [vmem:[#allocation2 + $0x48] sm:$0xff] %vm2458_vm0, %v654_v10  ;;  %v2250_v62 = vld [vmem:[#allocation3 + $0x38] sm:$0xff] }
 0x199   : > { %865 = vst.msk [vmem:[#allocation3 + $0x48] sm:$0xff] %vm302_vm2, %v848_v11  ;;  %977 = vperm.xlu1 %1755, %v927_v15   ;;  %v616_v18 = vpop.f32.mrb[20].mxu0  ;;  %v810_v19 = vpop.f32.mrb[20].mxu1  ;;  %v693_v9 = vld [vmem:[#allocation3 + $0x78] sm:$0xff]  ;;  %vm898_vm14 = vcmp.gt.f32.partialorder %v2250_v62, 0.0 }
 0x19a   : > { %v655_v20 = vadd.f32 %v616_v18, %v355_v16  ;;  %v849_v21 = vadd.f32 %v810_v19, %v688_v17  ;;  %v618_v22 = vpop.f32.mrb[21].mxu0  ;;  %v812_v24 = vpop.f32.mrb[21].mxu1  ;;  %v1264_v34 = vsel %vm898_vm14, 1, %v1871_v36 }
 0x19c   : > { %v2224_v27 = vld [vmem:[#allocation3 + $0x40] sm:$0xff]  ;;  %672 = vst.msk [vmem:[#allocation2 + $0x50] sm:$0xff] %vm2458_vm0, %v655_v20 }
 0x19d   : > { %866 = vst.msk [vmem:[#allocation3 + $0x50] sm:$0xff] %vm302_vm2, %v849_v21  ;;  %1766 = vrcp.f32 %v2224_v27  ;;  %v621_v28 = vpop.f32.mrb[22].mxu0  ;;  %v815_v29 = vpop.f32.mrb[22].mxu1  ;;  %vm899_vm8 = vcmp.gt.f32.partialorder %v2224_v27, 0.0 }
 0x19e   : > { %v656_v30 = vadd.f32 %v621_v28, %v356_v25  ;;  %v850_v31 = vadd.f32 %v815_v29, %v689_v26  ;;  %v623_v32 = vpop.f32.mrb[23].mxu0  ;;  %v817_v33 = vpop.f32.mrb[23].mxu1 }
 0x1a0   : > { %v2229_v38 = vld [vmem:[#allocation3 + $0x48] sm:$0xff]  ;;  %673 = vst.msk [vmem:[#allocation2 + $0x58] sm:$0xff] %vm2458_vm0, %v656_v30 }
 0x1a1   : > { %867 = vst.msk [vmem:[#allocation3 + $0x58] sm:$0xff] %vm302_vm2, %v850_v31  ;;  %1768 = vrcp.f32 %v2229_v38  ;;  %v626_v40 = vpop.f32.mrb[24].mxu0  ;;  %v820_v41 = vpop.f32.mrb[24].mxu1  ;;  %vm900_vm9 = vcmp.gt.f32.partialorder %v2229_v38, 0.0 }
 0x1a2   : > { %v657_v42 = vadd.f32 %v626_v40, %v357_v35  ;;  %v851_v43 = vadd.f32 %v820_v41, %v690_v37  ;;  %v628_v44 = vpop.f32.mrb[25].mxu0  ;;  %v822_v45 = vpop.f32.mrb[25].mxu1  ;;  %1770 = vrcp.f32 %v2231_v39  ;;  %v1257_v40 = vsel %vm891_vm3, 1, %v1871_v36 }
 0x1a3   : > { %v1266_v39 = vsel %vm900_vm9, 1, %v1871_v36  ;;  %vm2461_vm3 = vcmask 392192  }
 0x1a4   : > { %v2237_v48 = vld [vmem:[#allocation3 + $0x50] sm:$0xff]  ;;  %674 = vst.msk [vmem:[#allocation2 + $0x60] sm:$0xff] %vm2458_vm0, %v657_v42  ;;  %vm2462_vm4 = vmmov %vm2461_vm3 }
 0x1a5   : > { %868 = vst.msk [vmem:[#allocation3 + $0x60] sm:$0xff] %vm302_vm2, %v851_v43  ;;  %1772 = vrcp.f32 %v2237_v48  ;;  %v631_v51 = vpop.f32.mrb[26].mxu0  ;;  %v825_v52 = vpop.f32.mrb[26].mxu1  ;;  %vm901_vm11 = vcmp.gt.f32.partialorder %v2237_v48, 0.0  ;;  %v1259_v43 = vsel %vm893_vm5, 1, %v1871_v36  ;;  %vm2463_vm5 = vmmov %vm2461_vm3 }
 0x1a6   : > { %v658_v54 = vadd.f32 %v631_v51, %v358_v46  ;;  %v852_v55 = vadd.f32 %v825_v52, %v691_v47  ;;  %v633_v56 = vpop.f32.mrb[27].mxu0  ;;  %v827_v57 = vpop.f32.mrb[27].mxu1  ;;  %1774 = vrcp.f32 %v2239_v50  ;;  %v1263_v47 = vsel %vm897_vm12, 1, %v1871_v36 }
 0x1a7   : > { %v1767_v53 = vpop.eup %1766  ;;  %v1265_v51 = vsel %vm899_vm8, 1, %v1871_v36  ;;  %v1267_v50 = vsel %vm901_vm11, 1, %v1871_v36  ;;  %v939_v56 = vld [vmem:[#allocation2] sm:$0xff] }
 0x1a8   : > { %v931_v59 = vsel %vm899_vm8, %v1767_v53, 0.0  ;;  %v2248_v61 = vld [vmem:[#allocation3 + $0x58] sm:$0xff]  ;;  %675 = vst.msk [vmem:[#allocation2 + $0x68] sm:$0xff] %vm2458_vm0, %v658_v54 }
 0x1a9   : > { %869 = vst.msk [vmem:[#allocation3 + $0x68] sm:$0xff] %vm302_vm2, %v852_v55  ;;  %997 = vperm.xlu1 %1755, %v931_v59   ;;  %1776 = vrcp.f32 %v2248_v61  ;;  %v636_v63 = vpop.f32.mrb[28].mxu0  ;;  %v830_v1 = vpop.f32.mrb[28].mxu1  ;;  %vm902_vm13 = vcmp.gt.f32.partialorder %v2248_v61, 0.0  ;;  %v941_v61 = vld [vmem:[#allocation2 + $0x10] sm:$0xff] }
 0x1aa   : > { %v659_v3 = vadd.f32 %v636_v63, %v359_v58  ;;  %v853_v4 = vadd.f32 %v830_v1, %v692_v60  ;;  %v638_v0 = vpop.f32.mrb[29].mxu0  ;;  %v832_v6 = vpop.f32.mrb[29].mxu1  ;;  %1778 = vrcp.f32 %v2250_v62  ;;  %v1268_v52 = vsel %vm902_vm13, 1, %v1871_v36  ;;  %v940_v58 = vld [vmem:[#allocation2 + $0x8] sm:$0xff]  ;;  %v942_v1 = vld [vmem:[#allocation2 + $0x18] sm:$0xff] }
 0x1ab   : > { %v1769_v2 = vpop.eup %1768  ;;  %v947_v6 = vld [vmem:[#allocation2 + $0x40] sm:$0xff] }
 0x1ac   : > { %v932_v7 = vsel %vm900_vm9, %v1769_v2, 0.0  ;;  %v2259_v10 = vld [vmem:[#allocation3 + $0x60] sm:$0xff]  ;;  %v1771_v11 = vpop.eup %1770  ;;  %676 = vst.msk [vmem:[#allocation2 + $0x70] sm:$0xff] %vm2458_vm0, %v659_v3 }
 0x1ad   : > { %870 = vst.msk [vmem:[#allocation3 + $0x70] sm:$0xff] %vm302_vm2, %v853_v4  ;;  %1002 = vperm.xlu1 %1755, %v932_v7   ;;  %1780 = vrcp.f32 %v2259_v10  ;;  %v641_v12 = vpop.f32.mrb[30].mxu0  ;;  %v835_v13 = vpop.f32.mrb[30].mxu1  ;;  %v928_v20 = vsel %vm896_vm10, %v1771_v11, 0.0  ;;  %vm903_vm15 = vcmp.gt.f32.partialorder %v2259_v10, 0.0  ;;  %v943_v3 = vld [vmem:[#allocation2 + $0x20] sm:$0xff] }
 0x1ae   : > { %v660_v16 = vadd.f32 %v641_v12, %v360_v8  ;;  %v854_v17 = vadd.f32 %v835_v13, %v693_v9  ;;  %v643_v18 = vpop.f32.mrb[31].mxu0  ;;  %v837_v19 = vpop.f32.mrb[31].mxu1  ;;  %v1269_v27 = vsel %vm903_vm15, 1, %v1871_v36  ;;  %v948_v9 = vld [vmem:[#allocation2 + $0x48] sm:$0xff]  ;;  %v949_v12 = vld [vmem:[#allocation2 + $0x50] sm:$0xff] }
 0x1af   : > { %v1773_v15 = vpop.eup %1772  ;;  %v950_v19 = vld [vmem:[#allocation2 + $0x58] sm:$0xff] }
 0x1b0   : > { %v933_v21 = vsel %vm901_vm11, %v1773_v15, 0.0  ;;  %v2270_v22 = vld [vmem:[#allocation3 + $0x68] sm:$0xff]  ;;  %v1775_v24 = vpop.eup %1774  ;;  %677 = vst.msk [vmem:[#allocation2 + $0x78] sm:$0xff] %vm2458_vm0, %v660_v16 }
 0x1b1   : > { %871 = vst.msk [vmem:[#allocation3 + $0x78] sm:$0xff] %vm302_vm2, %v854_v17  ;;  %982 = vperm.xlu1 %1755, %v928_v20   ;;  %1007 = vperm.xlu0 %1754, %v933_v21   ;;  %1782 = vrcp.f32 %v2270_v22  ;;  %v929_v26 = vsel %vm897_vm12, %v1775_v24, 0.0  ;;  %vm904_vm1 = vcmp.gt.f32.partialorder %v2270_v22, 0.0  ;;  %v944_v15 = vld [vmem:[#allocation2 + $0x28] sm:$0xff]  ;;  %v945_v21 = vld [vmem:[#allocation2 + $0x30] sm:$0xff] }
 0x1b2   : > { %v1270_v53 = vsel %vm904_vm1, 1, %v1871_v36 }
 0x1b3   : > { %v1777_v25 = vpop.eup %1776 }
 0x1b4   : > { %v934_v28 = vsel %vm902_vm13, %v1777_v25, 0.0  ;;  %v889_v29 = vld [vmem:[#allocation3 + $0x70] sm:$0xff]  ;;  %v1779_v30 = vpop.eup %1778 }
 0x1b5   : > { %987 = vperm.xlu1 %1755, %v929_v26   ;;  %1012 = vperm.xlu0 %1754, %v934_v28   ;;  %1784 = vrcp.f32 %v889_v29  ;;  %v930_v32 = vsel %vm898_vm14, %v1779_v30, 0.0  ;;  %vm905_vm2 = vcmp.gt.f32.partialorder %v889_v29, 0.0  ;;  %v951_v26 = vld [vmem:[#allocation2 + $0x60] sm:$0xff]  ;;  %v946_v29 = vld [vmem:[#allocation2 + $0x38] sm:$0xff] }
 0x1b6   : > { %v1271_v48 = vsel %vm905_vm2, 1, %v1871_v36 }
 0x1b7   : > { %v1781_v31 = vpop.eup %1780 }
 0x1b8   : > { %v935_v33 = vsel %vm903_vm15, %v1781_v31, 0.0  ;;  %v890_v35 = vld [vmem:[#allocation3 + $0x78] sm:$0xff] }
 0x1b9   : > { %992 = vperm.xlu1 %1755, %v930_v32   ;;  %1017 = vperm.xlu0 %1754, %v935_v33   ;;  %1786 = vrcp.f32 %v890_v35  ;;  %vm906_vm0 = vcmp.gt.f32.partialorder %v890_v35, 0.0  ;;  %v952_v33 = vld [vmem:[#allocation2 + $0x68] sm:$0xff] }
 0x1ba   : > { %v1272_v54 = vsel %vm906_vm0, 1, %v1871_v36 }
 0x1bb   : > { %v1783_v37 = vpop.eup %1782 }
 0x1bc   : > { %v936_v41 = vsel %vm904_vm1, %v1783_v37, 0.0 }
 0x1bd   : > { %1274 = vperm.xlu1 %1755, %v1257_v40   ;;  %1022 = vperm.xlu0 %1754, %v936_v41   ;;  %v953_v40 = vld [vmem:[#allocation2 + $0x70] sm:$0xff] }
 0x1bf   : > { %v1785_v42 = vpop.eup %1784 }
 0x1c0   : > { %v937_v44 = vsel %vm905_vm2, %v1785_v42, 0.0 }
 0x1c1   : > { %1280 = vperm.xlu1 %1755, %v1259_v43   ;;  %1027 = vperm.xlu0 %1754, %v937_v44   ;;  %v954_v43 = vld [vmem:[#allocation2 + $0x78] sm:$0xff] }
 0x1c3   : > { %v1787_v45 = vpop.eup %1786 }
 0x1c4   : > { %v938_v46 = vsel %vm906_vm0, %v1787_v45, 0.0  ;;  %vm2464_vm0 = vmmov %vm2461_vm3  ;;  %v2360_v45 = vld [vmem:[%s2456_s3] ss:$0 sm:$0xff] }
 0x1c5   : > { %1286 = vperm.xlu1 %1755, %v1261_v5   ;;  %1032 = vperm.xlu0 %1754, %v938_v46   ;;  %vm2465_vm6 = vmmov %vm2464_vm0 }
 0x1c6   : > { %vm2466_vm7 = vmmov %vm2464_vm0 }
 0x1c7   : > { %vm2467_vm8 = vmmov %vm2464_vm0 }
 0x1c8   : > { %vm2468_vm9 = vmmov %vm2464_vm0 }
 0x1c9   : > { %1292 = vperm.xlu1 %1755, %v1263_v47   ;;  %1277 = vperm.xlu0 %1754, %v1258_v23   ;;  %vm2469_vm10 = vmmov %vm2464_vm0 }
 0x1ca   : > { %vm2470_vm11 = vmmov %vm2464_vm0 }
 0x1cb   : > { %vm2471_vm12 = vmmov %vm2464_vm0 }
 0x1cc   : > { %vm2472_vm13 = vmmov %vm2464_vm0 }
 0x1cd   : > { %1298 = vperm.xlu1 %1755, %v1265_v51   ;;  %1283 = vperm.xlu0 %1754, %v1260_v49   ;;  %vm2473_vm14 = vmmov %vm2464_vm0 }
 0x1ce   : > { %vm2474_vm15 = vmmov %vm2464_vm0 }
 0x1cf   : > { %vm2475_vm1 = vmmov %vm2464_vm0 }
 0x1d0   : > { %vm2476_vm2 = vmmov %vm2464_vm0 }
 0x1d1   : > { %1304 = vperm.xlu1 %1755, %v1267_v50   ;;  %1289 = vperm.xlu0 %1754, %v1262_v14  }
 0x1d5   : > { %1310 = vperm.xlu1 %1755, %v1269_v27   ;;  %1295 = vperm.xlu0 %1754, %v1264_v34  }
 0x1d9   : > { %1316 = vperm.xlu1 %1755, %v1271_v48   ;;  %1301 = vperm.xlu0 %1754, %v1266_v39  }
 0x1dd   : > { %1307 = vperm.xlu0 %1754, %v1268_v52  }
 0x1e1   : > { %1313 = vperm.xlu0 %1754, %v1270_v53  }
 0x1e5   : > { %1319 = vperm.xlu0 %1754, %v1272_v54  }
 0x208   : > { %v958_v55 = vpop.permute.xlu0 %957 }
 0x209   : > { %v1035_v38 = vmul.f32 %v958_v55, %v939_v56 }
 0x20b   : > { %1585 = vmatprep.mubr.msk.f32.mxu0 %vm2461_vm3, %v1035_v38 }
 0x20c   : > { %v963_v57 = vpop.permute.xlu1 %962 }
 0x20d   : > { %v1036_v59 = vmul.f32 %v963_v57, %v940_v58 }
 0x20f   : > { %1586 = vmatmul.mubr.msk.f32.vlgmr.msra.gmra.mrb[32].mxu0 %vm2462_vm4, %v1036_v59 }
 0x210   : > { %v968_v60 = vpop.permute.xlu1 %967 }
 0x211   : > { %v1037_v62 = vmul.f32 %v968_v60, %v941_v61 }
 0x213   : > { %1588 = vmatprep.mubr.msk.f32.mxu0 %vm2463_vm5, %v1037_v62 }
 0x214   : > { %v973_v63 = vpop.permute.xlu1 %972 }
 0x215   : > { %v1038_v2 = vmul.f32 %v973_v63, %v942_v1 }
 0x217   : > { %1589 = vmatmul.mubr.msk.f32.gmra.mrb[34].mxu0 %vm2464_vm0, %v1038_v2 }
 0x218   : > { %v978_v36 = vpop.permute.xlu1 %977 }
 0x219   : > { %v1039_v4 = vmul.f32 %v978_v36, %v943_v3 }
 0x21b   : > { %1591 = vmatprep.mubr.msk.f32.mxu0 %vm2465_vm6, %v1039_v4 }
 0x228   : > { %v998_v0 = vpop.permute.xlu1 %997 }
 0x229   : > { %v1043_v7 = vmul.f32 %v998_v0, %v947_v6 }
 0x22b   : > { %1597 = vmatprep.mubr.msk.f32.mxu1 %vm2466_vm7, %v1043_v7 }
 0x22c   : > { %v1003_v8 = vpop.permute.xlu1 %1002 }
 0x22d   : > { %v1044_v10 = vmul.f32 %v1003_v8, %v948_v9 }
 0x22f   : > { %1598 = vmatmul.mubr.msk.f32.vlgmr.msra.gmra.mrb[32].mxu1 %vm2467_vm8, %v1044_v10 }
 0x230   : > { %v1008_v11 = vpop.permute.xlu0 %1007  ;;  %v983_v13 = vpop.permute.xlu1 %982 }
 0x231   : > { %v1045_v16 = vmul.f32 %v1008_v11, %v949_v12  ;;  %v1040_v17 = vmul.f32 %v983_v13, %v944_v15 }
 0x233   : > { %1592 = vmatmul.mubr.msk.f32.gmra.mrb[36].mxu0 %vm2468_vm9, %v1040_v17  ;;  %1600 = vmatprep.mubr.msk.f32.mxu1 %vm2469_vm10, %v1045_v16 }
 0x234   : > { %v1013_v18 = vpop.permute.xlu0 %1012  ;;  %v988_v20 = vpop.permute.xlu1 %987 }
 0x235   : > { %v1046_v22 = vmul.f32 %v1013_v18, %v950_v19  ;;  %v1041_v24 = vmul.f32 %v988_v20, %v945_v21 }
 0x237   : > { %1594 = vmatprep.mubr.msk.f32.mxu0 %vm2470_vm11, %v1041_v24  ;;  %1601 = vmatmul.mubr.msk.f32.gmra.mrb[34].mxu1 %vm2471_vm12, %v1046_v22 }
 0x238   : > { %v1018_v25 = vpop.permute.xlu0 %1017  ;;  %v993_v28 = vpop.permute.xlu1 %992 }
 0x239   : > { %v1047_v30 = vmul.f32 %v1018_v25, %v951_v26  ;;  %v1042_v31 = vmul.f32 %v993_v28, %v946_v29 }
 0x23b   : > { %1595 = vmatmul.mubr.msk.f32.gmra.mrb[38].mxu0 %vm2472_vm13, %v1042_v31  ;;  %1603 = vmatprep.mubr.msk.f32.mxu1 %vm2473_vm14, %v1047_v30 }
 0x23c   : > { %v1023_v32 = vpop.permute.xlu0 %1022  ;;  %v1275_v46 = vpop.permute.xlu1 %1274 }
 0x23d   : > { %v1048_v35 = vmul.f32 %v1023_v32, %v952_v33  ;;  %vm1321_vm4 = vcmp.eq.s32.totalorder %v1275_v46, 1 }
 0x23f   : > { %1604 = vmatmul.mubr.msk.f32.gmra.mrb[36].mxu1 %vm2474_vm15, %v1048_v35 }
 0x240   : > { %v1028_v37 = vpop.permute.xlu0 %1027  ;;  %v1281_v34 = vpop.permute.xlu1 %1280 }
 0x241   : > { %v1049_v41 = vmul.f32 %v1028_v37, %v953_v40  ;;  %vm1323_vm0 = vcmp.eq.s32.totalorder %v1281_v34, 1 }
 0x243   : > { %1606 = vmatprep.mubr.msk.f32.mxu1 %vm2475_vm1, %v1049_v41 }
 0x244   : > { %v1033_v42 = vpop.permute.xlu0 %1032  ;;  %v1287_v38 = vpop.permute.xlu1 %1286 }
 0x245   : > { %v1050_v44 = vmul.f32 %v1033_v42, %v954_v43  ;;  %vm1325_vm9 = vcmp.eq.s32.totalorder %v1287_v38, 1 }
 0x247   : > { %1607 = vmatmul.mubr.msk.f32.gmra.mrb[38].mxu1 %vm2476_vm2, %v1050_v44 }
 0x248   : > { %v1278_v5 = vpop.permute.xlu0 %1277  ;;  %v1293_v58 = vpop.permute.xlu1 %1292 }
 0x249   : > { %vm1322_vm3 = vcmp.eq.s32.totalorder %v1278_v5, 1  ;;  %vm1327_vm13 = vcmp.eq.s32.totalorder %v1293_v58, 1 }
 0x24c   : > { %v1284_v27 = vpop.permute.xlu0 %1283  ;;  %v1299_v60 = vpop.permute.xlu1 %1298 }
 0x24d   : > { %vm1324_vm5 = vcmp.eq.s32.totalorder %v1284_v27, 1  ;;  %vm1329_vm7 = vcmp.eq.s32.totalorder %v1299_v60, 1 }
 0x250   : > { %v1290_v56 = vpop.permute.xlu0 %1289  ;;  %v1305_v9 = vpop.permute.xlu1 %1304 }
 0x251   : > { %vm1326_vm8 = vcmp.eq.s32.totalorder %v1290_v56, 1  ;;  %vm1331_vm11 = vcmp.eq.s32.totalorder %v1305_v9, 1 }
 0x254   : > { %v1296_v57 = vpop.permute.xlu0 %1295  ;;  %v1311_v25 = vpop.permute.xlu1 %1310 }
 0x255   : > { %vm1328_vm12 = vcmp.eq.s32.totalorder %v1296_v57, 1  ;;  %vm1333_vm15 = vcmp.eq.s32.totalorder %v1311_v25, 1 }
 0x258   : > { %v1302_v59 = vpop.permute.xlu0 %1301  ;;  %v1317_v37 = vpop.permute.xlu1 %1316 }
 0x259   : > { %vm1330_vm6 = vcmp.eq.s32.totalorder %v1302_v59, 1  ;;  %vm1335_vm2 = vcmp.eq.s32.totalorder %v1317_v37, 1 }
 0x25c   : > { %v1308_v7 = vpop.permute.xlu0 %1307 }
 0x25d   : > { %vm1332_vm10 = vcmp.eq.s32.totalorder %v1308_v7, 1 }
 0x260   : > { %v1314_v22 = vpop.permute.xlu0 %1313 }
 0x261   : > { %vm1334_vm14 = vcmp.eq.s32.totalorder %v1314_v22, 1 }
 0x264   : > { %v1320_v35 = vpop.permute.xlu0 %1319 }
 0x265   : > { %vm1336_vm1 = vcmp.eq.s32.totalorder %v1320_v35, 1 }
 0x2e2   : > { %v1587_v47 = vpop.f32.mrb[32].mxu0 }
 0x2e3   : > { %v1184_v23 = vadd.f32 %v1587_v47, %v2360_v45  ;;  %v1178_v51 = vpop.f32.mrb[33].mxu0 }
 0x2e4   : > { %v1179_v49 = vadd.f32 %v2360_v45, %v1178_v51 }
 0x2e5   : > { %v1338_v50 = vsel %vm1322_vm3, %v1184_v23, 0.0 }
 0x2e6   : > { %1354 = vst [vmem:[%s2364_s11 + $0x8] sm:$0xff] %v1338_v50  ;;  %v1337_v14 = vsel %vm1321_vm4, %v1179_v49, 0.0 }
 0x2e7   : > { %1353 = vst [vmem:[%s2364_s11] sm:$0xff] %v1337_v14 }
 0x2ea   : > { %v1590_v48 = vpop.f32.mrb[34].mxu0 }
 0x2eb   : > { %v1194_v39 = vadd.f32 %v1590_v48, %v2360_v45  ;;  %v1188_v52 = vpop.f32.mrb[35].mxu0 }
 0x2ec   : > { %v1189_v53 = vadd.f32 %v2360_v45, %v1188_v52 }
 0x2ed   : > { %v1340_v54 = vsel %vm1324_vm5, %v1194_v39, 0.0 }
 0x2ee   : > { %1356 = vst [vmem:[%s2364_s11 + $0x18] sm:$0xff] %v1340_v54  ;;  %v1339_v55 = vsel %vm1323_vm0, %v1189_v53, 0.0 }
 0x2ef   : > { %1355 = vst [vmem:[%s2364_s11 + $0x10] sm:$0xff] %v1339_v55 }
 0x302   : > { %v1599_v61 = vpop.f32.mrb[32].mxu1 }
 0x303   : > { %v1224_v62 = vadd.f32 %v1599_v61, %v2360_v45  ;;  %v1218_v63 = vpop.f32.mrb[33].mxu1 }
 0x304   : > { %v1219_v1 = vadd.f32 %v2360_v45, %v1218_v63 }
 0x305   : > { %v1346_v2 = vsel %vm1330_vm6, %v1224_v62, 0.0 }
 0x306   : > { %1362 = vst [vmem:[%s2364_s11 + $0x48] sm:$0xff] %v1346_v2  ;;  %v1345_v36 = vsel %vm1329_vm7, %v1219_v1, 0.0  ;;  %v1593_v3 = vpop.f32.mrb[36].mxu0 }
 0x307   : > { %1361 = vst [vmem:[%s2364_s11 + $0x40] sm:$0xff] %v1345_v36  ;;  %v1204_v4 = vadd.f32 %v1593_v3, %v2360_v45  ;;  %v1198_v0 = vpop.f32.mrb[37].mxu0 }
 0x308   : > { %v1199_v6 = vadd.f32 %v2360_v45, %v1198_v0 }
 0x309   : > { %v1342_v8 = vsel %vm1326_vm8, %v1204_v4, 0.0 }
 0x30a   : > { %1358 = vst [vmem:[%s2364_s11 + $0x28] sm:$0xff] %v1342_v8  ;;  %v1341_v10 = vsel %vm1325_vm9, %v1199_v6, 0.0  ;;  %v1602_v11 = vpop.f32.mrb[34].mxu1 }
 0x30b   : > { %1357 = vst [vmem:[%s2364_s11 + $0x20] sm:$0xff] %v1341_v10  ;;  %v1234_v12 = vadd.f32 %v1602_v11, %v2360_v45  ;;  %v1228_v13 = vpop.f32.mrb[35].mxu1 }
 0x30c   : > { %v1229_v15 = vadd.f32 %v2360_v45, %v1228_v13 }
 0x30d   : > { %v1348_v16 = vsel %vm1332_vm10, %v1234_v12, 0.0 }
 0x30e   : > { %1364 = vst [vmem:[%s2364_s11 + $0x58] sm:$0xff] %v1348_v16  ;;  %v1347_v17 = vsel %vm1331_vm11, %v1229_v15, 0.0  ;;  %v1596_v18 = vpop.f32.mrb[38].mxu0 }
 0x30f   : > { %1363 = vst [vmem:[%s2364_s11 + $0x50] sm:$0xff] %v1347_v17  ;;  %v1214_v19 = vadd.f32 %v1596_v18, %v2360_v45  ;;  %v1208_v20 = vpop.f32.mrb[39].mxu0 }
 0x310   : > { %v1209_v21 = vadd.f32 %v2360_v45, %v1208_v20 }
 0x311   : > { %v1344_v24 = vsel %vm1328_vm12, %v1214_v19, 0.0 }
 0x312   : > { %1360 = vst [vmem:[%s2364_s11 + $0x38] sm:$0xff] %v1344_v24  ;;  %v1343_v26 = vsel %vm1327_vm13, %v1209_v21, 0.0  ;;  %v1605_v28 = vpop.f32.mrb[36].mxu1 }
 0x313   : > { %1359 = vst [vmem:[%s2364_s11 + $0x30] sm:$0xff] %v1343_v26  ;;  %v1244_v29 = vadd.f32 %v1605_v28, %v2360_v45  ;;  %v1238_v30 = vpop.f32.mrb[37].mxu1 }
 0x314   : > { %v1239_v31 = vadd.f32 %v2360_v45, %v1238_v30 }
 0x315   : > { %v1350_v32 = vsel %vm1334_vm14, %v1244_v29, 0.0 }
 0x316   : > { %1366 = vst [vmem:[%s2364_s11 + $0x68] sm:$0xff] %v1350_v32  ;;  %v1349_v33 = vsel %vm1333_vm15, %v1239_v31, 0.0 }
 0x317   : > { %1365 = vst [vmem:[%s2364_s11 + $0x60] sm:$0xff] %v1349_v33 }
 0x31a   : > { %v1608_v40 = vpop.f32.mrb[38].mxu1 }
 0x31b   : > { %v1254_v41 = vadd.f32 %v1608_v40, %v2360_v45  ;;  %v1248_v42 = vpop.f32.mrb[39].mxu1 }
 0x31c   : > { %v1249_v43 = vadd.f32 %v2360_v45, %v1248_v42 }
 0x31d   : > { %v1352_v44 = vsel %vm1336_vm1, %v1254_v41, 0.0 }
 0x31e   : > { %1368 = vst [vmem:[%s2364_s11 + $0x78] sm:$0xff] %v1352_v44  ;;  %v1351_v5 = vsel %vm1335_vm2, %v1249_v43, 0.0 }
 0x31f   : > { %1367 = vst [vmem:[%s2364_s11 + $0x70] sm:$0xff] %v1351_v5 }
 0x320   : > { %1801 = shalt.err (!%p1798_p5)
}
 0x321   : > { %s1802_s5 = scalar_lea.hbm %s2399_s22, 2048  ;;  %s1806_s8 = scalar_lea.hbm %s2457_s4, 4096 }
 0x322   : > { %p1803_p6 = scmp.ne.s32.totalorder %s2399_s22, %s1802_s5  ;;  %p1807_p10 = scmp.lt.u32.totalorder %s2399_s22, %s2457_s4 }
 0x323   : > { %p1808_p11 = scmp.lt.u32.totalorder %s1806_s8, %s1802_s5  ;;  %p1810_p13 = scmp.lt.u32.totalorder %s1802_s5, %s2399_s22 }
 0x324   : > { %p1804_p7 = pnand %p1803_p6, %p1940_p4 }
 0x325   : > { %p1809_p12 = por %p1808_p11, %p1807_p10 }
 0x326   : > { %p1805_p9 = pneg %p1804_p7 }
 0x327   : > { %p1811_p0 = por %p1810_p13, %p1809_p12 }
 0x329   : > { %p1812_p1 = pnand %p1811_p0, %p1805_p9 }
 0x32b   : > { %1815 = shalt.err (!%p1812_p1)
}
 0x32c   : > { %s1873_s11 = smov 128   ;;  %s1874_s12 = smov 8  }
 0x32d   : > { %1693 = dma.vmem_to_hbm [thread:$0]  (%p1940_p4), %s2401_s13, 2048, %s2399_s22, %s2407_s18, %s1873_s11, %s1873_s11, %s1874_s12  }
 0x32e PF: > { %p1699_p2 = scmp.ge.s32.totalorder %s1866_s20, 2  ;;  %s1400_s14 = sand.u32 1, %s1846_s15  }
 0x32f   : > { %s1401_s21 = scalar_lea.sflag [#allocation5], %s1400_s14 }
 0x330   : > { %p1696_p3 = pnand %p1699_p2, %p1947_p8 }
 0x332   : > { %1841 = dma.done.wait (!%p1696_p3), %s1401_s21, 2048  }
 0x333   : > { %1843 = vsyncadd (!%p1696_p3), %s1401_s21, 4294965248  ;;  %s17_s20 = sadd.s32 1, %s1866_s20   ;;  %s2477_s15 = smov %s1850_s16 }
 0x334   : > { %p14_p5 = scmp.ge.s32.totalorder %s17_s20, 4   ;;  %s2478_s16 = smov %s1854_s17 }
 0x335   : > { %s2479_s17 = smov %s1953_s28  ;;  %s2480_s18 = smov %s1862_s19 }
 0x336   : > { %s2481_s19 = smov %s2483_s23  ;;  %16 = sbr.rel (!%p14_p5) target bundleno = 4 (0x4), region = 82 }
 0x33d   :  { %1406 = vsyncpa [#allocation5], 1 }
 0x33e   :  { %1408 = vsyncpa [#allocation5 + $0x1], 1 }

</bundles_post_ra>
